<compile_context>
chip_gen: v7x
topology: tpu7x:2x2x1
jax: 0.10.0
libtpu: 0.0.40
codegen_flags: <defaults>
</compile_context>

<pallas_src>
import functools

import jax
import jax.numpy as jnp
from jax.experimental import pallas as pl
from jax.experimental.pallas import tpu as pltpu


# ------------------------------ static dims ---------------------------------
IN_DIM = 310          # model input / feature width
IN_PAD = 384          # padded to 3 * 128 lanes
H1 = 128              # first hidden width (already lane-aligned)
H2 = 100              # second hidden width
H2_PAD = 128          # padded to 128 lanes
NCLASS = 3
NDOMAIN = 5
OUT_PAD = 128         # per-head padded logit width
OUT_SLAB = 2 * OUT_PAD
NEG = -1e30           # finite "minus infinity" for padded softmax lanes


def _round_up(n, m):
    return ((n + m - 1) // m) * m


# ----------------------------------------------------------------------------
# Pallas kernel: whole 3-head MLP forward for one batch tile (VMEM resident).
# ----------------------------------------------------------------------------
def _cnnmodel_kernel(
    x_ref,
    # feature extractor (BN folded, padded)
    w1, b1, w2, b2, w3, b3,
    # merged class/domain first layer + class tail + domain tail
    wcd1, bcd1, wc2, bc2, wc3, bc3, wd2, bd2,
    # output: (TB, 256) = [class log-probs (128 lanes) | domain log-probs (128)]
    out_ref,
):
    def linear(h, w_ref, b_ref):
        return (
            jnp.dot(h, w_ref[...], preferred_element_type=jnp.float32)
            + b_ref[...]
        )

    def relu(y):
        return jnp.maximum(y, 0.0)

    def log_softmax(z):
        m = jnp.max(z, axis=-1, keepdims=True)
        shifted = z - m
        lse = jnp.log(jnp.sum(jnp.exp(shifted), axis=-1, keepdims=True))
        return shifted - lse

    x = x_ref[...]                               # (TB, 384), lanes 310: are 0

    # --- feature extractor (BN pre-folded into W/b) --------------------------
    h = relu(linear(x, w1, b1))                  # (TB, 128)
    h = relu(linear(h, w2, b2))                  # (TB, 128), lanes 100: are 0
    feature = log_softmax(linear(h, w3, b3))     # (TB, 384), pad lanes ~ -1e30

    # reverse_feature = ReverseLayerF(feature, alpha) == feature in forward.

    # --- merged class/domain first layer: one 256-wide MXU push --------------
    cd = relu(linear(feature, wcd1, bcd1))       # (TB, 256)
    c = cd[:, :H1]                               # class branch  (TB, 128)
    d = cd[:, H1:]                               # domain branch (TB, 128)

    # --- class classifier tail ------------------------------------------------
    c = relu(linear(c, wc2, bc2))                # (TB, 128), lanes 100: are 0
    class_lsm = log_softmax(linear(c, wc3, bc3))     # (TB, 128), valid 0:3

    # --- domain classifier tail ------------------------------------------------
    domain_lsm = log_softmax(linear(d, wd2, bd2))    # (TB, 128), valid 0:5

    out_ref[:, :OUT_PAD] = class_lsm
    out_ref[:, OUT_PAD:] = domain_lsm


# ----------------------------------------------------------------------------
# Parameter packing: fold BN, merge heads, pad to clean tiles (done ONCE).
# ----------------------------------------------------------------------------
def pack_params(params):
    (w1, b1, s1, t1, w2, b2, s2, t2, w3, b3,
     wc1, bc1, sc1, tc1, wc2, bc2, sc2, tc2, wc3, bc3,
     wd1, bd1, sd1, td1, wd2, bd2) = params

    def fold(w, b, s, t):
        # (x @ w + b) * s + t == x @ (w * s) + (b * s + t)   (exact for eval BN)
        return w * s, b * s + t

    def pad(w, b, k_pad, n_pad, bias_fill=0.0):
        k, n = w.shape
        w = jnp.pad(w, ((0, k_pad - k), (0, n_pad - n)))
        b = jnp.pad(b, ((0, 0), (0, n_pad - n)), constant_values=bias_fill)
        return w, b

    # feature extractor
    w1f, b1f = fold(w1, b1, s1, t1)
    w1f, b1f = pad(w1f, b1f, IN_PAD, H1)                       # (384, 128)
    w2f, b2f = fold(w2, b2, s2, t2)
    w2f, b2f = pad(w2f, b2f, H1, H2_PAD)                       # (128, 128)
    # padded logit lanes of the feature log_softmax get NEG so LSE ignores them
    w3f, b3f = pad(w3, b3, H2_PAD, IN_PAD, bias_fill=NEG)      # (128, 384)

    # class + domain first layers, merged into one (384, 256) matmul
    wc1f, bc1f = fold(wc1, bc1, sc1, tc1)
    wd1f, bd1f = fold(wd1, bd1, sd1, td1)
    wcd1 = jnp.pad(jnp.concatenate([wc1f, wd1f], axis=1),
                   ((0, IN_PAD - IN_DIM), (0, 0)))             # (384, 256)
    bcd1 = jnp.concatenate([bc1f, bd1f], axis=1)               # (1, 256)

    wc2f, bc2f = fold(wc2, bc2, sc2, tc2)
    wc2f, bc2f = pad(wc2f, bc2f, H1, H2_PAD)                   # (128, 128)
    wc3f, bc3f = pad(wc3, bc3, H2_PAD, OUT_PAD, bias_fill=NEG)  # (128, 128)

    wd2f, bd2f = pad(wd2, bd2, H1, OUT_PAD, bias_fill=NEG)     # (128, 128)

    return (w1f, b1f, w2f, b2f, w3f, b3f,
            wcd1, bcd1, wc2f, bc2f, wc3f, bc3f, wd2f, bd2f)


# ----------------------------------------------------------------------------
# Wrapper: batch grid, constant weight index_maps, lane-dense output slab.
# ----------------------------------------------------------------------------
@functools.partial(jax.jit, static_argnames=("block_b",))
def cnnmodel_forward(x, alpha, packed_params, *, block_b=256):
    """x: (B, 310) float32. alpha unused in forward (gradient reversal only)."""
    del alpha  # identity in the forward pass
    B = x.shape[0]

    tb = _round_up(min(block_b, _round_up(B, 8)), 8)   # batch tile (sublane mult.)
    b_pad = _round_up(B, tb)
    nb = b_pad // tb

    xp = jnp.pad(x, ((0, b_pad - B), (0, IN_PAD - IN_DIM)))

    x_spec = pl.BlockSpec((tb, IN_PAD), lambda i: (i, 0))
    weight_specs = [
        pl.BlockSpec(p.shape, lambda i: (0, 0))        # constant -> VMEM resident
        for p in packed_params
    ]
    out_spec = pl.BlockSpec((tb, OUT_SLAB), lambda i: (i, 0))

    out = pl.pallas_call(
        _cnnmodel_kernel,
        out_shape=jax.ShapeDtypeStruct((b_pad, OUT_SLAB), jnp.float32),
        grid_spec=pltpu.PrefetchScalarGridSpec(
            num_scalar_prefetch=0,
            grid=(nb,),
            in_specs=[x_spec] + weight_specs,
            out_specs=out_spec,
        ),
        compiler_params=pltpu.CompilerParams(
            dimension_semantics=("parallel",),          # megacore on v7x
        ),
    )(xp, *packed_params)

    class_out = out[:B, :NCLASS]
    domain_out = out[:B, OUT_PAD:OUT_PAD + NDOMAIN]
    return class_out, domain_out


# ----------------------------------------------------------------------------
# Deterministic parameter construction (synthetic weights, PyTorch layout
# pre-transposed to (in, out); BatchNorm given directly as eval scale/shift).
# ----------------------------------------------------------------------------
def _make_params(key):
    def linear_params(key, fan_in, fan_out):
        kw, kb = jax.random.split(key)
        bound = 1.0 / jnp.sqrt(fan_in)
        w = jax.random.uniform(kw, (fan_in, fan_out), jnp.float32, -bound, bound)
        b = jax.random.uniform(kb, (1, fan_out), jnp.float32, -bound, bound)
        return w, b

    def bn_params(key, dim, eps=1e-5):
        kg, kb, km, kv = jax.random.split(key, 4)
        gamma = 1.0 + 0.1 * jax.random.normal(kg, (1, dim), jnp.float32)
        beta = 0.1 * jax.random.normal(kb, (1, dim), jnp.float32)
        mean = 0.05 * jax.random.normal(km, (1, dim), jnp.float32)
        var = 1.0 + 0.1 * jax.random.uniform(kv, (1, dim), jnp.float32)
        scale = gamma / jnp.sqrt(var + eps)     # eval-mode BN as scale/shift
        shift = beta - mean * scale
        return scale, shift

    keys = jax.random.split(key, 16)
    # feature extractor
    w1, b1 = linear_params(keys[0], IN_DIM, H1)
    s1, t1 = bn_params(keys[1], H1)
    w2, b2 = linear_params(keys[2], H1, H2)
    s2, t2 = bn_params(keys[3], H2)
    w3, b3 = linear_params(keys[4], H2, IN_DIM)
    # class classifier
    wc1, bc1 = linear_params(keys[5], IN_DIM, H1)
    sc1, tc1 = bn_params(keys[6], H1)
    wc2, bc2 = linear_params(keys[7], H1, H2)
    sc2, tc2 = bn_params(keys[8], H2)
    wc3, bc3 = linear_params(keys[9], H2, NCLASS)
    # domain classifier
    wd1, bd1 = linear_params(keys[10], IN_DIM, H1)
    sd1, td1 = bn_params(keys[11], H1)
    wd2, bd2 = linear_params(keys[12], H1, NDOMAIN)

    return (
        w1, b1, s1, t1, w2, b2, s2, t2, w3, b3,
        wc1, bc1, sc1, tc1, wc2, bc2, sc2, tc2, wc3, bc3,
        wd1, bd1, sd1, td1, wd2, bd2,
    )


# ----------------------------------------------------------------------------
# Pure-JAX reference. BN is folded the same way as in the kernel (the fold is
# mathematically exact for eval-mode BN), so matmul-precision effects cancel
# and a tight tolerance remains valid.
# ----------------------------------------------------------------------------
def _reference_forward(x, params):
    (w1, b1, s1, t1, w2, b2, s2, t2, w3, b3,
     wc1, bc1, sc1, tc1, wc2, bc2, sc2, tc2, wc3, bc3,
     wd1, bd1, sd1, td1, wd2, bd2) = params

    def lbr(h, w, b, s, t):
        return jnp.maximum(h @ (w * s) + (b * s + t), 0.0)

    def lsm(z):
        return jax.nn.log_softmax(z, axis=1)

    h = lbr(x, w1, b1, s1, t1)
    h = lbr(h, w2, b2, s2, t2)
    feat = lsm(h @ w3 + b3)
    c = lbr(feat, wc1, bc1, sc1, tc1)
    c = lbr(c, wc2, bc2, sc2, tc2)
    class_out = lsm(c @ wc3 + bc3)
    d = lbr(feat, wd1, bd1, sd1, td1)
    domain_out = lsm(d @ wd2 + bd2)
    return class_out, domain_out


if __name__ == "__main__":
    key = jax.random.PRNGKey(0)
    k_x, k_p = jax.random.split(key)

    B = 64  # small demo batch; block_b=16 exercises a 4-step pipelined grid
    x = jax.random.normal(k_x, (B, IN_DIM), dtype=jnp.float32)
    alpha = 0.5  # only affects backward (gradient reversal); identity here
    raw_params = _make_params(k_p)
    packed_params = pack_params(raw_params)

    class_out, domain_out = cnnmodel_forward(x, alpha, packed_params, block_b=16)
    class_out = jax.block_until_ready(class_out)
    domain_out = jax.block_until_ready(domain_out)

    ref_class, ref_domain = _reference_forward(x, raw_params)
    assert class_out.shape == (B, NCLASS) and domain_out.shape == (B, NDOMAIN)
    assert jnp.allclose(class_out, ref_class, atol=1e-4, rtol=1e-4)
    assert jnp.allclose(domain_out, ref_domain, atol=1e-4, rtol=1e-4)

    print("KERNEL_OK")
</pallas_src>

<mosaic_0001>
module attributes {stable_mosaic.version = 11 : i64} {
  func.func @_cnnmodel_kernel(%arg0: i32, %arg1: memref<16x384xf32, #tpu.memory_space<vmem>>, %arg2: memref<384x128xf32, #tpu.memory_space<vmem>>, %arg3: memref<1x128xf32, #tpu.memory_space<vmem>>, %arg4: memref<128x128xf32, #tpu.memory_space<vmem>>, %arg5: memref<1x128xf32, #tpu.memory_space<vmem>>, %arg6: memref<128x384xf32, #tpu.memory_space<vmem>>, %arg7: memref<1x384xf32, #tpu.memory_space<vmem>>, %arg8: memref<384x256xf32, #tpu.memory_space<vmem>>, %arg9: memref<1x256xf32, #tpu.memory_space<vmem>>, %arg10: memref<128x128xf32, #tpu.memory_space<vmem>>, %arg11: memref<1x128xf32, #tpu.memory_space<vmem>>, %arg12: memref<128x128xf32, #tpu.memory_space<vmem>>, %arg13: memref<1x128xf32, #tpu.memory_space<vmem>>, %arg14: memref<128x128xf32, #tpu.memory_space<vmem>>, %arg15: memref<1x128xf32, #tpu.memory_space<vmem>>, %arg16: memref<16x256xf32, #tpu.memory_space<vmem>>) attributes {dimension_semantics = [#tpu.dimension_semantics<parallel>], iteration_bounds = array<i64: 4>, scalar_prefetch = 0 : i64, scratch_operands = 0 : i64, tpu.core_type = #tpu.core_type<tc>, window_params = [{transform_indices = @transform_0, window_bounds = array<i64: 16, 384>}, {pipeline_mode = #tpu.pipeline_mode<synchronous>, transform_indices = @transform_1, window_bounds = array<i64: 384, 128>}, {pipeline_mode = #tpu.pipeline_mode<synchronous>, transform_indices = @transform_2, window_bounds = array<i64: 1, 128>}, {pipeline_mode = #tpu.pipeline_mode<synchronous>, transform_indices = @transform_3, window_bounds = array<i64: 128, 128>}, {pipeline_mode = #tpu.pipeline_mode<synchronous>, transform_indices = @transform_4, window_bounds = array<i64: 1, 128>}, {pipeline_mode = #tpu.pipeline_mode<synchronous>, transform_indices = @transform_5, window_bounds = array<i64: 128, 384>}, {pipeline_mode = #tpu.pipeline_mode<synchronous>, transform_indices = @transform_6, window_bounds = array<i64: 1, 384>}, {pipeline_mode = #tpu.pipeline_mode<synchronous>, transform_indices = @transform_7, window_bounds = array<i64: 384, 256>}, {pipeline_mode = #tpu.pipeline_mode<synchronous>, transform_indices = @transform_8, window_bounds = array<i64: 1, 256>}, {pipeline_mode = #tpu.pipeline_mode<synchronous>, transform_indices = @transform_9, window_bounds = array<i64: 128, 128>}, {pipeline_mode = #tpu.pipeline_mode<synchronous>, transform_indices = @transform_10, window_bounds = array<i64: 1, 128>}, {pipeline_mode = #tpu.pipeline_mode<synchronous>, transform_indices = @transform_11, window_bounds = array<i64: 128, 128>}, {pipeline_mode = #tpu.pipeline_mode<synchronous>, transform_indices = @transform_12, window_bounds = array<i64: 1, 128>}, {pipeline_mode = #tpu.pipeline_mode<synchronous>, transform_indices = @transform_13, window_bounds = array<i64: 128, 128>}, {pipeline_mode = #tpu.pipeline_mode<synchronous>, transform_indices = @transform_14, window_bounds = array<i64: 1, 128>}, {transform_indices = @transform_15, window_bounds = array<i64: 16, 256>}]} {
    %c0 = arith.constant 0 : index
    %c0_0 = arith.constant 0 : index
    %0 = vector.load %arg1[%c0, %c0_0] : memref<16x384xf32, #tpu.memory_space<vmem>>, vector<16x384xf32>
    %c0_1 = arith.constant 0 : index
    %c0_2 = arith.constant 0 : index
    %1 = vector.load %arg2[%c0_1, %c0_2] : memref<384x128xf32, #tpu.memory_space<vmem>>, vector<384x128xf32>
    %cst = arith.constant dense<0.000000e+00> : vector<16x128xf32>
    %2 = tpu.matmul %0, %1, %cst {dimension_numbers = #tpu.dot_dimension_numbers<[1], [0], [0], [1], [0, 0, 1, 1], [], []>} : vector<16x384xf32>, vector<384x128xf32>, vector<16x128xf32> -> vector<16x128xf32>
    %c0_3 = arith.constant 0 : index
    %c0_4 = arith.constant 0 : index
    %3 = vector.load %arg3[%c0_3, %c0_4] : memref<1x128xf32, #tpu.memory_space<vmem>>, vector<1x128xf32>
    %4 = vector.broadcast %3 : vector<1x128xf32> to vector<16x128xf32>
    %5 = arith.addf %2, %4 : vector<16x128xf32>
    %cst_5 = arith.constant 0.000000e+00 : f32
    %6 = vector.broadcast %cst_5 : f32 to vector<16x128xf32>
    %7 = arith.maximumf %5, %6 : vector<16x128xf32>
    %c0_6 = arith.constant 0 : index
    %c0_7 = arith.constant 0 : index
    %8 = vector.load %arg4[%c0_6, %c0_7] : memref<128x128xf32, #tpu.memory_space<vmem>>, vector<128x128xf32>
    %cst_8 = arith.constant dense<0.000000e+00> : vector<16x128xf32>
    %9 = tpu.matmul %7, %8, %cst_8 {dimension_numbers = #tpu.dot_dimension_numbers<[1], [0], [0], [1], [0, 0, 1, 1], [], []>} : vector<16x128xf32>, vector<128x128xf32>, vector<16x128xf32> -> vector<16x128xf32>
    %c0_9 = arith.constant 0 : index
    %c0_10 = arith.constant 0 : index
    %10 = vector.load %arg5[%c0_9, %c0_10] : memref<1x128xf32, #tpu.memory_space<vmem>>, vector<1x128xf32>
    %11 = vector.broadcast %10 : vector<1x128xf32> to vector<16x128xf32>
    %12 = arith.addf %9, %11 : vector<16x128xf32>
    %cst_11 = arith.constant 0.000000e+00 : f32
    %13 = vector.broadcast %cst_11 : f32 to vector<16x128xf32>
    %14 = arith.maximumf %12, %13 : vector<16x128xf32>
    %c0_12 = arith.constant 0 : index
    %c0_13 = arith.constant 0 : index
    %15 = vector.load %arg6[%c0_12, %c0_13] : memref<128x384xf32, #tpu.memory_space<vmem>>, vector<128x384xf32>
    %cst_14 = arith.constant dense<0.000000e+00> : vector<16x384xf32>
    %16 = tpu.matmul %14, %15, %cst_14 {dimension_numbers = #tpu.dot_dimension_numbers<[1], [0], [0], [1], [0, 0, 1, 1], [], []>} : vector<16x128xf32>, vector<128x384xf32>, vector<16x384xf32> -> vector<16x384xf32>
    %c0_15 = arith.constant 0 : index
    %c0_16 = arith.constant 0 : index
    %17 = vector.load %arg7[%c0_15, %c0_16] : memref<1x384xf32, #tpu.memory_space<vmem>>, vector<1x384xf32>
    %18 = vector.broadcast %17 : vector<1x384xf32> to vector<16x384xf32>
    %19 = arith.addf %16, %18 : vector<16x384xf32>
    %cst_17 = arith.constant dense<0xFF800000> : vector<16xf32>
    %20 = vector.multi_reduction <maximumf>, %19, %cst_17 [1] : vector<16x384xf32> to vector<16xf32>
    %21 = vector.shape_cast %20 : vector<16xf32> to vector<16x1xf32>
    %22 = vector.broadcast %21 : vector<16x1xf32> to vector<16x384xf32>
    %23 = arith.subf %19, %22 : vector<16x384xf32>
    %24 = math.exp %23 : vector<16x384xf32>
    %cst_18 = arith.constant dense<0.000000e+00> : vector<16xf32>
    %25 = vector.multi_reduction <add>, %24, %cst_18 [1] : vector<16x384xf32> to vector<16xf32>
    %26 = vector.shape_cast %25 : vector<16xf32> to vector<16x1xf32>
    %27 = math.log %26 : vector<16x1xf32>
    %28 = vector.broadcast %27 : vector<16x1xf32> to vector<16x384xf32>
    %29 = arith.subf %23, %28 : vector<16x384xf32>
    %c0_19 = arith.constant 0 : index
    %c0_20 = arith.constant 0 : index
    %30 = vector.load %arg8[%c0_19, %c0_20] : memref<384x256xf32, #tpu.memory_space<vmem>>, vector<384x256xf32>
    %cst_21 = arith.constant dense<0.000000e+00> : vector<16x256xf32>
    %31 = tpu.matmul %29, %30, %cst_21 {dimension_numbers = #tpu.dot_dimension_numbers<[1], [0], [0], [1], [0, 0, 1, 1], [], []>} : vector<16x384xf32>, vector<384x256xf32>, vector<16x256xf32> -> vector<16x256xf32>
    %c0_22 = arith.constant 0 : index
    %c0_23 = arith.constant 0 : index
    %32 = vector.load %arg9[%c0_22, %c0_23] : memref<1x256xf32, #tpu.memory_space<vmem>>, vector<1x256xf32>
    %33 = vector.broadcast %32 : vector<1x256xf32> to vector<16x256xf32>
    %34 = arith.addf %31, %33 : vector<16x256xf32>
    %cst_24 = arith.constant 0.000000e+00 : f32
    %35 = vector.broadcast %cst_24 : f32 to vector<16x256xf32>
    %36 = arith.maximumf %34, %35 : vector<16x256xf32>
    %37 = vector.extract_strided_slice %36 {offsets = [0, 0], sizes = [16, 128], strides = [1, 1]} : vector<16x256xf32> to vector<16x128xf32>
    %38 = vector.extract_strided_slice %36 {offsets = [0, 128], sizes = [16, 128], strides = [1, 1]} : vector<16x256xf32> to vector<16x128xf32>
    %c0_25 = arith.constant 0 : index
    %c0_26 = arith.constant 0 : index
    %39 = vector.load %arg10[%c0_25, %c0_26] : memref<128x128xf32, #tpu.memory_space<vmem>>, vector<128x128xf32>
    %cst_27 = arith.constant dense<0.000000e+00> : vector<16x128xf32>
    %40 = tpu.matmul %37, %39, %cst_27 {dimension_numbers = #tpu.dot_dimension_numbers<[1], [0], [0], [1], [0, 0, 1, 1], [], []>} : vector<16x128xf32>, vector<128x128xf32>, vector<16x128xf32> -> vector<16x128xf32>
    %c0_28 = arith.constant 0 : index
    %c0_29 = arith.constant 0 : index
    %41 = vector.load %arg11[%c0_28, %c0_29] : memref<1x128xf32, #tpu.memory_space<vmem>>, vector<1x128xf32>
    %42 = vector.broadcast %41 : vector<1x128xf32> to vector<16x128xf32>
    %43 = arith.addf %40, %42 : vector<16x128xf32>
    %cst_30 = arith.constant 0.000000e+00 : f32
    %44 = vector.broadcast %cst_30 : f32 to vector<16x128xf32>
    %45 = arith.maximumf %43, %44 : vector<16x128xf32>
    %c0_31 = arith.constant 0 : index
    %c0_32 = arith.constant 0 : index
    %46 = vector.load %arg12[%c0_31, %c0_32] : memref<128x128xf32, #tpu.memory_space<vmem>>, vector<128x128xf32>
    %cst_33 = arith.constant dense<0.000000e+00> : vector<16x128xf32>
    %47 = tpu.matmul %45, %46, %cst_33 {dimension_numbers = #tpu.dot_dimension_numbers<[1], [0], [0], [1], [0, 0, 1, 1], [], []>} : vector<16x128xf32>, vector<128x128xf32>, vector<16x128xf32> -> vector<16x128xf32>
    %c0_34 = arith.constant 0 : index
    %c0_35 = arith.constant 0 : index
    %48 = vector.load %arg13[%c0_34, %c0_35] : memref<1x128xf32, #tpu.memory_space<vmem>>, vector<1x128xf32>
    %49 = vector.broadcast %48 : vector<1x128xf32> to vector<16x128xf32>
    %50 = arith.addf %47, %49 : vector<16x128xf32>
    %cst_36 = arith.constant dense<0xFF800000> : vector<16xf32>
    %51 = vector.multi_reduction <maximumf>, %50, %cst_36 [1] : vector<16x128xf32> to vector<16xf32>
    %52 = vector.shape_cast %51 : vector<16xf32> to vector<16x1xf32>
    %53 = vector.broadcast %52 : vector<16x1xf32> to vector<16x128xf32>
    %54 = arith.subf %50, %53 : vector<16x128xf32>
    %55 = math.exp %54 : vector<16x128xf32>
    %cst_37 = arith.constant dense<0.000000e+00> : vector<16xf32>
    %56 = vector.multi_reduction <add>, %55, %cst_37 [1] : vector<16x128xf32> to vector<16xf32>
    %57 = vector.shape_cast %56 : vector<16xf32> to vector<16x1xf32>
    %58 = math.log %57 : vector<16x1xf32>
    %59 = vector.broadcast %58 : vector<16x1xf32> to vector<16x128xf32>
    %60 = arith.subf %54, %59 : vector<16x128xf32>
    %c0_38 = arith.constant 0 : index
    %c0_39 = arith.constant 0 : index
    %61 = vector.load %arg14[%c0_38, %c0_39] : memref<128x128xf32, #tpu.memory_space<vmem>>, vector<128x128xf32>
    %cst_40 = arith.constant dense<0.000000e+00> : vector<16x128xf32>
    %62 = tpu.matmul %38, %61, %cst_40 {dimension_numbers = #tpu.dot_dimension_numbers<[1], [0], [0], [1], [0, 0, 1, 1], [], []>} : vector<16x128xf32>, vector<128x128xf32>, vector<16x128xf32> -> vector<16x128xf32>
    %c0_41 = arith.constant 0 : index
    %c0_42 = arith.constant 0 : index
    %63 = vector.load %arg15[%c0_41, %c0_42] : memref<1x128xf32, #tpu.memory_space<vmem>>, vector<1x128xf32>
    %64 = vector.broadcast %63 : vector<1x128xf32> to vector<16x128xf32>
    %65 = arith.addf %62, %64 : vector<16x128xf32>
    %cst_43 = arith.constant dense<0xFF800000> : vector<16xf32>
    %66 = vector.multi_reduction <maximumf>, %65, %cst_43 [1] : vector<16x128xf32> to vector<16xf32>
    %67 = vector.shape_cast %66 : vector<16xf32> to vector<16x1xf32>
    %68 = vector.broadcast %67 : vector<16x1xf32> to vector<16x128xf32>
    %69 = arith.subf %65, %68 : vector<16x128xf32>
    %70 = math.exp %69 : vector<16x128xf32>
    %cst_44 = arith.constant dense<0.000000e+00> : vector<16xf32>
    %71 = vector.multi_reduction <add>, %70, %cst_44 [1] : vector<16x128xf32> to vector<16xf32>
    %72 = vector.shape_cast %71 : vector<16xf32> to vector<16x1xf32>
    %73 = math.log %72 : vector<16x1xf32>
    %74 = vector.broadcast %73 : vector<16x1xf32> to vector<16x128xf32>
    %75 = arith.subf %69, %74 : vector<16x128xf32>
    %c0_45 = arith.constant 0 : index
    %c0_46 = arith.constant 0 : index
    %76 = vector.load %arg16[%c0_45, %c0_46] : memref<16x256xf32, #tpu.memory_space<vmem>>, vector<16x128xf32>
    tpu.vector_store %arg16[%c0_45, %c0_46], %60 {strides = array<i32>} : memref<16x256xf32, #tpu.memory_space<vmem>>, vector<16x128xf32>,
    %c0_47 = arith.constant 0 : index
    %c128 = arith.constant 128 : index
    %77 = vector.load %arg16[%c0_47, %c128] : memref<16x256xf32, #tpu.memory_space<vmem>>, vector<16x128xf32>
    tpu.vector_store %arg16[%c0_47, %c128], %75 {strides = array<i32>} : memref<16x256xf32, #tpu.memory_space<vmem>>, vector<16x128xf32>,
    return
  }
  func.func @transform_0(%arg0: i32) -> (i32, i32) {
    %c0_i32 = arith.constant 0 : i32
    %c0_i32_0 = arith.constant 0 : i32
    return %arg0, %c0_i32 : i32, i32
  }
  func.func @transform_1(%arg0: i32) -> (i32, i32) {
    %c0_i32 = arith.constant 0 : i32
    %c0_i32_0 = arith.constant 0 : i32
    %c0_i32_1 = arith.constant 0 : i32
    return %c0_i32, %c0_i32_0 : i32, i32
  }
  func.func @transform_2(%arg0: i32) -> (i32, i32) {
    %c0_i32 = arith.constant 0 : i32
    %c0_i32_0 = arith.constant 0 : i32
    %c0_i32_1 = arith.constant 0 : i32
    return %c0_i32, %c0_i32_0 : i32, i32
  }
  func.func @transform_3(%arg0: i32) -> (i32, i32) {
    %c0_i32 = arith.constant 0 : i32
    %c0_i32_0 = arith.constant 0 : i32
    %c0_i32_1 = arith.constant 0 : i32
    return %c0_i32, %c0_i32_0 : i32, i32
  }
  func.func @transform_4(%arg0: i32) -> (i32, i32) {
    %c0_i32 = arith.constant 0 : i32
    %c0_i32_0 = arith.constant 0 : i32
    %c0_i32_1 = arith.constant 0 : i32
    return %c0_i32, %c0_i32_0 : i32, i32
  }
  func.func @transform_5(%arg0: i32) -> (i32, i32) {
    %c0_i32 = arith.constant 0 : i32
    %c0_i32_0 = arith.constant 0 : i32
    %c0_i32_1 = arith.constant 0 : i32
    return %c0_i32, %c0_i32_0 : i32, i32
  }
  func.func @transform_6(%arg0: i32) -> (i32, i32) {
    %c0_i32 = arith.constant 0 : i32
    %c0_i32_0 = arith.constant 0 : i32
    %c0_i32_1 = arith.constant 0 : i32
    return %c0_i32, %c0_i32_0 : i32, i32
  }
  func.func @transform_7(%arg0: i32) -> (i32, i32) {
    %c0_i32 = arith.constant 0 : i32
    %c0_i32_0 = arith.constant 0 : i32
    %c0_i32_1 = arith.constant 0 : i32
    return %c0_i32, %c0_i32_0 : i32, i32
  }
  func.func @transform_8(%arg0: i32) -> (i32, i32) {
    %c0_i32 = arith.constant 0 : i32
    %c0_i32_0 = arith.constant 0 : i32
    %c0_i32_1 = arith.constant 0 : i32
    return %c0_i32, %c0_i32_0 : i32, i32
  }
  func.func @transform_9(%arg0: i32) -> (i32, i32) {
    %c0_i32 = arith.constant 0 : i32
    %c0_i32_0 = arith.constant 0 : i32
    %c0_i32_1 = arith.constant 0 : i32
    return %c0_i32, %c0_i32_0 : i32, i32
  }
  func.func @transform_10(%arg0: i32) -> (i32, i32) {
    %c0_i32 = arith.constant 0 : i32
    %c0_i32_0 = arith.constant 0 : i32
    %c0_i32_1 = arith.constant 0 : i32
    return %c0_i32, %c0_i32_0 : i32, i32
  }
  func.func @transform_11(%arg0: i32) -> (i32, i32) {
    %c0_i32 = arith.constant 0 : i32
    %c0_i32_0 = arith.constant 0 : i32
    %c0_i32_1 = arith.constant 0 : i32
    return %c0_i32, %c0_i32_0 : i32, i32
  }
  func.func @transform_12(%arg0: i32) -> (i32, i32) {
    %c0_i32 = arith.constant 0 : i32
    %c0_i32_0 = arith.constant 0 : i32
    %c0_i32_1 = arith.constant 0 : i32
    return %c0_i32, %c0_i32_0 : i32, i32
  }
  func.func @transform_13(%arg0: i32) -> (i32, i32) {
    %c0_i32 = arith.constant 0 : i32
    %c0_i32_0 = arith.constant 0 : i32
    %c0_i32_1 = arith.constant 0 : i32
    return %c0_i32, %c0_i32_0 : i32, i32
  }
  func.func @transform_14(%arg0: i32) -> (i32, i32) {
    %c0_i32 = arith.constant 0 : i32
    %c0_i32_0 = arith.constant 0 : i32
    %c0_i32_1 = arith.constant 0 : i32
    return %c0_i32, %c0_i32_0 : i32, i32
  }
  func.func @transform_15(%arg0: i32) -> (i32, i32) {
    %c0_i32 = arith.constant 0 : i32
    %c0_i32_0 = arith.constant 0 : i32
    return %arg0, %c0_i32 : i32, i32
  }
}

</mosaic_0001>

<bundles_post_ra>
// kernel: cnnmodel_forward.1
= control target key start
LH: loop header
LB: loop body
LE: loop exit
PB: predicated region body
PF: predicated region fallthrough
CT: control target
= control target key end

     0   :  { %s3491_s0 = inlined_call_operand.vmem [shape: f32[64,384], index: 0, kind: input, shape index: {}]   ;;  %s3492_s1 = inlined_call_operand.vmem [shape: f32[384,128], index: 1, kind: input, shape index: {}]   ;;  %s3493_s2 = inlined_call_operand.vmem [shape: f32[1,128], index: 2, kind: input, shape index: {}]   ;;  %s3494_s3 = inlined_call_operand.hbm [shape: f32[128,128], index: 3, kind: input, shape index: {}]   ;;  %s3495_s4 = inlined_call_operand.vmem [shape: f32[1,128], index: 4, kind: input, shape index: {}]   ;;  %s3496_s5 = inlined_call_operand.hbm [shape: f32[128,384], index: 5, kind: input, shape index: {}]   ;;  %s3497_s6 = inlined_call_operand.vmem [shape: f32[1,384], index: 6, kind: input, shape index: {}]   ;;  %s3498_s7 = inlined_call_operand.hbm [shape: f32[384,256], index: 7, kind: input, shape index: {}]   ;;  %s3499_s8 = inlined_call_operand.vmem [shape: f32[1,256], index: 8, kind: input, shape index: {}]   ;;  %s3500_s9 = inlined_call_operand.hbm [shape: f32[128,128], index: 9, kind: input, shape index: {}]   ;;  %s3501_s10 = inlined_call_operand.vmem [shape: f32[1,128], index: 10, kind: input, shape index: {}]   ;;  %s3502_s11 = inlined_call_operand.hbm [shape: f32[128,128], index: 11, kind: input, shape index: {}]   ;;  %s3503_s12 = inlined_call_operand.vmem [shape: f32[1,128], index: 12, kind: input, shape index: {}]   ;;  %s3504_s13 = inlined_call_operand.hbm [shape: f32[128,128], index: 13, kind: input, shape index: {}]   ;;  %s3505_s14 = inlined_call_operand.vmem [shape: f32[1,128], index: 14, kind: input, shape index: {}]   ;;  %s3506_s15 = inlined_call_operand.vmem [shape: f32[64,256], index: 15, kind: output, shape index: {}]  }
   0x1   :  { %3515 = sst [smem:[#allocation16_spill]] %s3494_s3 }
   0x2   :  { %3516 = sst [smem:[#allocation17_spill]] %s3496_s5 }
   0x3   :  { %3517 = sst [smem:[#allocation18_spill]] %s3501_s10 }
   0x4   :  { %3518 = sst [smem:[#allocation19_spill]] %s3503_s12 }
   0x5   :  { %3519 = sst [smem:[#allocation20_spill]] %s3505_s14 }
   0x6   :  { %3520 = sst [smem:[#allocation21_spill]] %s3506_s15 }
   0x7   :  { %20 = vsyncpa [#allocation3], 0 }
   0x8   :  { %21 = vsyncpa [#allocation5], 0 }
   0x9   :  { %22 = vsyncpa [#allocation8], 0 }
   0xa   :  { %23 = vsyncpa [#allocation11], 0  ;;  %s3029_s18 = smov 0  }
   0xb LB: > { %s2936_s19 = smov [#allocation4]   ;;  %s3507_s21 = sadd.s32 4294967295, %s2934_s18   ;;  %s2934_s18 = sphi %s3029_s18, %s29_s18  }
   0xc   : > { %s414_s20 = sshll.u32 %s2936_s19, 4  ;;  %p1891_p0 = scmp.ge.s32.totalorder %s2934_s18, 1  ;;  %s3043_s20 = int_to_ptr.vmem [resolvable:$true] %s414_s20 }
   0xd   : > { %p380_p1 = scmp.lt.s32.totalorder %s2934_s18, 5  ;;  %p3039_p2 = scmp.eq.s32.totalorder %s3507_s21, 0 }
   0xe   : > { %s2937_s25 = smov [#allocation7]   ;;  %s2938_s27 = smov [#allocation2]  }
   0xf   : > { %s3521_s22 = scalar_select %p3039_p2, 1, 0 }
  0x10   : > { %p3045_p3 = pnand %p1891_p0, %p380_p1  ;;  %s446_s26 = sshll.u32 %s2937_s25, 4  ;;  %s3057_s26 = int_to_ptr.vmem [resolvable:$true] %s446_s26 }
  0x11   : > { %s398_s28 = sshll.u32 %s2938_s27, 4  ;;  %s3524_s5 = sld [smem:[#allocation17_spill]]  ;;  %s3059_s28 = int_to_ptr.vmem [resolvable:$true] %s398_s28 }
  0x12   : > { %s3522_s23 = scalar_select %p3045_p3, 1, 0 }
  0x13   : > { %p2660_p4 = pneg %p3045_p3 }
  0x15   : > { %p3053_p5 = pnand %p3039_p2, %p2660_p4 }
  0x17   : > { %s2744_s16 = scalar_lea.hbm %s3524_s5, 6144  ;;  %p3069_p7 = pneg %p3053_p5 }
  0x18   : > { %p2745_p6 = scmp.ne.s32.totalorder %s3524_s5, %s2744_s16  ;;  %p2751_p10 = scmp.lt.u32.totalorder %s2744_s16, %s3524_s5 }
  0x1a   : > { %p2747_p8 = pnand %p3069_p7, %p2745_p6 }
  0x1c   : > { %p2748_p9 = pneg %p2747_p8 }
  0x1e   : > { %p2753_p11 = pnand %p2751_p10, %p2748_p9 }
  0x20   : > { %2756 = shalt.err (!%p2753_p11)
}
  0x21   : > { %s2757_s29 = scalar_lea.vmem %s3043_s20, 6144  ;;  %p2765_p1 = scmp.lt.s32.totalorder %s3043_s20, %s3043_s20 }
  0x22   : > { %p2758_p12 = scmp.ne.s32.totalorder %s3043_s20, %s2757_s29  ;;  %p2766_p4 = scmp.lt.s32.totalorder %s2757_s29, %s2757_s29 }
  0x24   : > { %p2760_p13 = pnand %p2758_p12, %p3069_p7  ;;  %p2767_p6 = por %p2766_p4, %p2765_p1 }
  0x26   : > { %p2761_p0 = pneg %p2760_p13 }
  0x28   : > { %p2768_p8 = pnand %p2767_p6, %p2761_p0 }
  0x2a   : > { %2771 = shalt.err (!%p2768_p8)
}
  0x2b   : > { %s2939_s30 = smov 384   ;;  %s2940_s16 = smov 24  }
  0x2c   : > { %2666 = dma.hbm_to_vmem [thread:$0]  (!%p3053_p5), %s3524_s5, 6144, %s3043_s20, [#allocation5], %s2939_s30, %s2939_s30, %s2940_s16  }
  0x2d   : > { %s2772_s15 = scalar_lea.hbm %s3500_s9, 2048 }
  0x2e   : > { %p2773_p9 = scmp.ne.s32.totalorder %s3500_s9, %s2772_s15  ;;  %p2779_p12 = scmp.lt.u32.totalorder %s2772_s15, %s3500_s9 }
  0x30   : > { %p2775_p10 = pnand %p2773_p9, %p3069_p7 }
  0x32   : > { %p2776_p11 = pneg %p2775_p10 }
  0x34   : > { %p2781_p13 = pnand %p2779_p12, %p2776_p11 }
  0x36   : > { %2784 = shalt.err (!%p2781_p13)
}
  0x37   : > { %s2785_s20 = scalar_lea.vmem %s3057_s26, 2048  ;;  %p2793_p6 = scmp.lt.s32.totalorder %s3057_s26, %s3057_s26 }
  0x38   : > { %p2786_p0 = scmp.ne.s32.totalorder %s3057_s26, %s2785_s20  ;;  %p2794_p8 = scmp.lt.s32.totalorder %s2785_s20, %s2785_s20 }
  0x3a   : > { %p2788_p1 = pnand %p2786_p0, %p3069_p7  ;;  %p2795_p9 = por %p2794_p8, %p2793_p6 }
  0x3c   : > { %p2789_p4 = pneg %p2788_p1 }
  0x3e   : > { %p2796_p10 = pnand %p2795_p9, %p2789_p4 }
  0x40   : > { %2799 = shalt.err (!%p2796_p10)
}
  0x41   : > { %s3511_s12 = smov 128   ;;  %s3513_s10 = smov 8  }
  0x42   : > { %2672 = dma.hbm_to_vmem [thread:$0]  (!%p3053_p5), %s3500_s9, 2048, %s3057_s26, [#allocation8], %s3511_s12, %s3511_s12, %s3513_s10  }
  0x43   : > { %s3526_s3 = sld [smem:[#allocation16_spill]] }
  0x49   : > { %s2800_s17 = scalar_lea.hbm %s3526_s3, 2048 }
  0x4a   : > { %p2801_p11 = scmp.ne.s32.totalorder %s3526_s3, %s2800_s17  ;;  %p2807_p0 = scmp.lt.u32.totalorder %s2800_s17, %s3526_s3 }
  0x4c   : > { %p2803_p12 = pnand %p2801_p11, %p3069_p7 }
  0x4e   : > { %p2804_p13 = pneg %p2803_p12 }
  0x50   : > { %p2809_p1 = pnand %p2807_p0, %p2804_p13 }
  0x52   : > { %2812 = shalt.err (!%p2809_p1)
}
  0x53   : > { %s2813_s26 = scalar_lea.vmem %s3059_s28, 2048  ;;  %p2821_p9 = scmp.lt.s32.totalorder %s3059_s28, %s3059_s28 }
  0x54   : > { %p2814_p4 = scmp.ne.s32.totalorder %s3059_s28, %s2813_s26  ;;  %p2822_p10 = scmp.lt.s32.totalorder %s2813_s26, %s2813_s26 }
  0x56   : > { %p2816_p6 = pnand %p2814_p4, %p3069_p7  ;;  %p2823_p11 = por %p2822_p10, %p2821_p9 }
  0x58   : > { %p2817_p8 = pneg %p2816_p6 }
  0x5a   : > { %p2824_p12 = pnand %p2823_p11, %p2817_p8 }
  0x5c   : > { %2827 = shalt.err (!%p2824_p12)
}
  0x5d   : > { %2663 = dma.hbm_to_vmem [thread:$0]  (!%p3053_p5), %s3526_s3, 2048, %s3059_s28, [#allocation3], %s3511_s12, %s3511_s12, %s3513_s10  }
  0x5e   : > { %s2943_s15 = smov [#allocation6]   ;;  %s2828_s19 = scalar_lea.hbm %s3498_s7, 12288 }
  0x5f   : > { %s430_s30 = sshll.u32 %s2943_s15, 4  ;;  %p2829_p13 = scmp.ne.s32.totalorder %s3498_s7, %s2828_s19  ;;  %s431_s30 = int_to_ptr.vmem [resolvable:$true] %s430_s30 }
  0x60   : > { %p2835_p4 = scmp.lt.u32.totalorder %s2828_s19, %s3498_s7 }
  0x61   : > { %p2831_p0 = pnand %p2829_p13, %p3069_p7 }
  0x63   : > { %p2832_p1 = pneg %p2831_p0 }
  0x65   : > { %p2837_p6 = pnand %p2835_p4, %p2832_p1 }
  0x67   : > { %2840 = shalt.err (!%p2837_p6)
}
  0x68   : > { %s2841_s28 = scalar_lea.vmem %s431_s30, 12288  ;;  %p2849_p11 = scmp.lt.s32.totalorder %s431_s30, %s431_s30 }
  0x69   : > { %p2842_p8 = scmp.ne.s32.totalorder %s431_s30, %s2841_s28  ;;  %p2850_p12 = scmp.lt.s32.totalorder %s2841_s28, %s2841_s28 }
  0x6b   : > { %p2844_p9 = pnand %p2842_p8, %p3069_p7  ;;  %p2851_p2 = por %p2850_p12, %p2849_p11 }
  0x6d   : > { %p2845_p10 = pneg %p2844_p9 }
  0x6f   : > { %p2852_p3 = pnand %p2851_p2, %p2845_p10 }
  0x71   : > { %2855 = shalt.err (!%p2852_p3)
}
  0x72   : > { %s2944_s20 = smov 256   ;;  %s2945_s14 = smov 16  }
  0x73   : > { %2669 = dma.hbm_to_vmem [thread:$0]  (!%p3053_p5), %s3498_s7, 12288, %s431_s30, [#allocation5], %s2944_s20, %s2944_s20, %s2945_s14  }
  0x74   : > { %s2946_s17 = smov [#allocation9]   ;;  %s2947_s25 = smov [#allocation10]  }
  0x75   : > { %s462_s19 = sshll.u32 %s2946_s17, 4  ;;  %s478_s27 = sshll.u32 %s2947_s25, 4  ;;  %s463_s19 = int_to_ptr.vmem [resolvable:$true] %s462_s19  ;;  %s479_s27 = int_to_ptr.vmem [resolvable:$true] %s478_s27 }
  0x76   : > { %s2856_s28 = scalar_lea.hbm %s3502_s11, 2048 }
  0x77   : > { %p2857_p2 = scmp.ne.s32.totalorder %s3502_s11, %s2856_s28  ;;  %p2863_p0 = scmp.lt.u32.totalorder %s2856_s28, %s3502_s11 }
  0x79   : > { %p2859_p3 = pnand %p2857_p2, %p3069_p7 }
  0x7b   : > { %p2860_p13 = pneg %p2859_p3 }
  0x7d   : > { %p2865_p1 = pnand %p2863_p0, %p2860_p13 }
  0x7f   : > { %2868 = shalt.err (!%p2865_p1)
}
  0x80   : > { %s2869_s30 = scalar_lea.vmem %s463_s19, 2048  ;;  %p2877_p9 = scmp.lt.s32.totalorder %s463_s19, %s463_s19 }
  0x81   : > { %p2870_p4 = scmp.ne.s32.totalorder %s463_s19, %s2869_s30  ;;  %p2878_p10 = scmp.lt.s32.totalorder %s2869_s30, %s2869_s30 }
  0x83   : > { %p2872_p6 = pnand %p2870_p4, %p3069_p7  ;;  %p2879_p11 = por %p2878_p10, %p2877_p9 }
  0x85   : > { %p2873_p8 = pneg %p2872_p6 }
  0x87   : > { %p2880_p12 = pnand %p2879_p11, %p2873_p8 }
  0x89   : > { %2883 = shalt.err (!%p2880_p12)
}
  0x8a   : > { %s3527_s12 = smov 8   ;;  %s3528_s10 = smov 128  }
  0x8b   : > { %2675 = dma.hbm_to_vmem [thread:$0]  (!%p3053_p5), %s3502_s11, 2048, %s463_s19, [#allocation8], %s3528_s10, %s3528_s10, %s3527_s12  }
  0x8c   : > { %s2884_s15 = scalar_lea.hbm %s3504_s13, 2048 }
  0x8d   : > { %p2885_p2 = scmp.ne.s32.totalorder %s3504_s13, %s2884_s15  ;;  %p2891_p0 = scmp.lt.u32.totalorder %s2884_s15, %s3504_s13 }
  0x8f   : > { %p2887_p3 = pnand %p2885_p2, %p3069_p7 }
  0x91   : > { %p2888_p13 = pneg %p2887_p3 }
  0x93   : > { %p2893_p1 = pnand %p2891_p0, %p2888_p13 }
  0x95   : > { %2896 = shalt.err (!%p2893_p1)
}
  0x96   : > { %s2897_s26 = scalar_lea.vmem %s479_s27, 2048  ;;  %p2905_p9 = scmp.lt.s32.totalorder %s479_s27, %s479_s27 }
  0x97   : > { %p2898_p4 = scmp.ne.s32.totalorder %s479_s27, %s2897_s26  ;;  %p2906_p10 = scmp.lt.s32.totalorder %s2897_s26, %s2897_s26 }
  0x99   : > { %p2900_p6 = pnand %p2898_p4, %p3069_p7  ;;  %p2907_p11 = por %p2906_p10, %p2905_p9 }
  0x9b   : > { %p2901_p8 = pneg %p2900_p6 }
  0x9d   : > { %p2908_p12 = pnand %p2907_p11, %p2901_p8 }
  0x9f   : > { %2911 = shalt.err (!%p2908_p12)
}
  0xa0   : > { %2678 = dma.hbm_to_vmem [thread:$0]  (!%p3053_p5), %s3504_s13, 2048, %s479_s27, [#allocation11], %s3528_s10, %s3528_s10, %s3527_s12  }
  0xa1   : > { %p3529_p2 = scmp.ne.s32.totalorder %s3522_s23, 0 }
  0xa2   : > { %p3530_p7 = scmp.ne.s32.totalorder (!%p3529_p2), %s3521_s22, 0 }
  0xa3   : > { %507 = sbr.rel (%p3529_p2) target bundleno = 2230 (0x8b6), region = 80 }
  0xaa   : > { %2917 = dma.done.wait (%p3530_p7), [#allocation3], 2048  }
  0xab   : > { %2919 = vsyncadd (%p3530_p7), [#allocation3], 4294965248 }
  0xac   : > { %2921 = dma.done.wait (%p3530_p7), [#allocation5], 18432  }
  0xad   : > { %2923 = vsyncadd (%p3530_p7), [#allocation5], 4294948864 }
  0xae   : > { %2925 = dma.done.wait (%p3530_p7), [#allocation8], 4096  }
  0xaf   : > { %2927 = vsyncadd (%p3530_p7), [#allocation8], 4294963200 }
  0xb0   : > { %2929 = dma.done.wait (%p3530_p7), [#allocation11], 2048  }
  0xb1   : > { %2931 = vsyncadd (%p3530_p7), [#allocation11], 4294965248  ;;  %s3531_s21 = sadd.s32 4294967295, %s2934_s18   ;;  %v613_v0 = vld [vmem:[%s3492_s1 + $0x80] sm:$0xff]  ;;  %v614_v1 = vld [vmem:[%s3492_s1 + $0x88] sm:$0xff]  ;;  %s3532_s19 = sld [smem:[#allocation18_spill]] }
  0xb2   : > { %s1906_s23 = sshll.u32 %s3531_s21, 1  ;;  %v597_v2 = vld [vmem:[%s3492_s1] sm:$0xff]  ;;  %v2275_v3 = vpack.c.bf16 %v614_v1, %v613_v0  ;;  %v598_v4 = vld [vmem:[%s3492_s1 + $0x8] sm:$0xff]  ;;  %v615_v5 = vld [vmem:[%s3492_s1 + $0x90] sm:$0xff]  ;;  %s3533_s24 = sld [smem:[#allocation19_spill]] }
  0xb3   : > { %p578_p5 = scmp.lt.s32.totalorder %s1906_s23, 7  ;;  %v616_v6 = vld [vmem:[%s3492_s1 + $0x98] sm:$0xff]  ;;  %v2277_v7 = vpack.c.bf16 %v598_v4, %v597_v2  ;;  %v629_v9 = vld [vmem:[%s3492_s1 + $0x100] sm:$0xff]  ;;  %v630_v10 = vld [vmem:[%s3492_s1 + $0x108] sm:$0xff]  ;;  %s3534_s10 = sld [smem:[#allocation20_spill]] }
  0xb4   : > { %v2279_v8 = vpack.c.bf16 %v616_v6, %v615_v5  ;;  %v599_v11 = vld [vmem:[%s3492_s1 + $0x10] sm:$0xff]  ;;  %2276 = vmatprep.subr.bf16.mxu0 %v2275_v3  ;;  %v2307_v12 = vpack.c.bf16 %v630_v10, %v629_v9  ;;  %v600_v13 = vld [vmem:[%s3492_s1 + $0x18] sm:$0xff]  ;;  %v617_v14 = vld [vmem:[%s3492_s1 + $0xa0] sm:$0xff]  ;;  %s3535_s20 = sld [smem:[#allocation21_spill]] }
  0xb5   : > { %v618_v15 = vld [vmem:[%s3492_s1 + $0xa8] sm:$0xff]  ;;  %2278 = vmatpush3.bf16.msra.mxu0 %v2277_v7  ;;  %v2281_v16 = vpack.c.bf16 %v600_v13, %v599_v11  ;;  %v631_v17 = vld [vmem:[%s3492_s1 + $0x110] sm:$0xff]  ;;  %v632_v18 = vld [vmem:[%s3492_s1 + $0x118] sm:$0xff]  ;;  %s3537_s23 = smov (!%p578_p5, %s1906_s23), 7 }
  0xb6   : > { %2280 = vmatprep.subr.bf16.mxu0 %v2279_v8  ;;  %2308 = vmatprep.subr.bf16.mxu1 %v2307_v12  ;;  %v2283_v19 = vpack.c.bf16 %v618_v15, %v617_v14  ;;  %v2311_v20 = vpack.c.bf16 %v632_v18, %v631_v17  ;;  %v601_v21 = vld [vmem:[%s3492_s1 + $0x20] sm:$0xff]  ;;  %v602_v22 = vld [vmem:[%s3492_s1 + $0x28] sm:$0xff]  ;;  %v619_v23 = vld [vmem:[%s3492_s1 + $0xb0] sm:$0xff]  ;;  %s2635_s5 = smul.u32 24, %s3537_s23  ;;  %s1918_s3 = sshll.u32 %s3537_s23, 4 }
  0xb7   : > { %2310 = vmatpush3.bf16.msra.mxu1 %v2307_v12  ;;  %v620_v24 = vld [vmem:[%s3492_s1 + $0xb8] sm:$0xff]  ;;  %v633_v25 = vld [vmem:[%s3492_s1 + $0x120] sm:$0xff]  ;;  %v634_v26 = vld [vmem:[%s3492_s1 + $0x128] sm:$0xff]  ;;  %v2285_v28 = vpack.c.bf16 %v602_v22, %v601_v21 }
  0xb8   : > { %2312 = vmatprep.subr.bf16.mxu1 %v2311_v20  ;;  %v2315_v27 = vpack.c.bf16 %v634_v26, %v633_v25  ;;  %v635_v29 = vld [vmem:[%s3492_s1 + $0x130] sm:$0xff]  ;;  %v636_v30 = vld [vmem:[%s3492_s1 + $0x138] sm:$0xff]  ;;  %v2287_v31 = vpack.c.bf16 %v620_v24, %v619_v23  ;;  %v621_v34 = vld [vmem:[%s3492_s1 + $0xc0] sm:$0xff]  ;;  %s3313_s30 = scalar_lea.vmem %s3491_s0, %s2635_s5 }
  0xb9   : > { %2282 = vmatpush3.bf16.msra.mxu0 %v2281_v16  ;;  %v603_v32 = vld [vmem:[%s3492_s1 + $0x30] sm:$0xff]  ;;  %v604_v33 = vld [vmem:[%s3492_s1 + $0x38] sm:$0xff]  ;;  %v622_v35 = vld [vmem:[%s3492_s1 + $0xc8] sm:$0xff]  ;;  %v2319_v36 = vpack.c.bf16 %v636_v30, %v635_v29 }
  0xba   : > { %2284 = vmatprep.subr.bf16.mxu0 %v2283_v19  ;;  %v2289_v37 = vpack.c.bf16 %v604_v33, %v603_v32  ;;  %v637_v38 = vld [vmem:[%s3492_s1 + $0x140] sm:$0xff]  ;;  %v638_v39 = vld [vmem:[%s3492_s1 + $0x148] sm:$0xff]  ;;  %v2291_v40 = vpack.c.bf16 %v622_v35, %v621_v34  ;;  %v623_v43 = vld [vmem:[%s3492_s1 + $0xd0] sm:$0xff]  ;;  %s589_s14 = scalar_lea.vmem %s3535_s20, %s1918_s3 }
  0xbb   : > { %2314 = vmatpush3.bf16.msra.mxu1 %v2311_v20  ;;  %v605_v41 = vld [vmem:[%s3492_s1 + $0x40] sm:$0xff]  ;;  %v606_v42 = vld [vmem:[%s3492_s1 + $0x48] sm:$0xff]  ;;  %v624_v44 = vld [vmem:[%s3492_s1 + $0xd8] sm:$0xff]  ;;  %v2323_v45 = vpack.c.bf16 %v638_v39, %v637_v38 }
  0xbc   : > { %2316 = vmatprep.subr.bf16.mxu1 %v2315_v27  ;;  %v592_v46 = vld [vmem:[%s3313_s30 + $0x8] sm:$0xff]  ;;  %v2293_v47 = vpack.c.bf16 %v606_v42, %v605_v41  ;;  %v639_v48 = vld [vmem:[%s3492_s1 + $0x150] sm:$0xff]  ;;  %v640_v49 = vld [vmem:[%s3492_s1 + $0x158] sm:$0xff]  ;;  %v2295_v50 = vpack.c.bf16 %v624_v44, %v623_v43 }
  0xbd   : > { %2286 = vmatpush3.bf16.msra.mxu0 %v2285_v28  ;;  %716 = vmatprep.mubr.f32.mxu0 %v592_v46  ;;  %v607_v51 = vld [vmem:[%s3492_s1 + $0x50] sm:$0xff]  ;;  %v608_v52 = vld [vmem:[%s3492_s1 + $0x58] sm:$0xff]  ;;  %v625_v54 = vld [vmem:[%s3492_s1 + $0xe0] sm:$0xff]  ;;  %v2327_v56 = vpack.c.bf16 %v640_v49, %v639_v48 }
  0xbe   : > { %2288 = vmatprep.subr.bf16.mxu0 %v2287_v31  ;;  %v593_v53 = vld [vmem:[%s3313_s30 + $0x10] sm:$0xff]  ;;  %v626_v55 = vld [vmem:[%s3492_s1 + $0xe8] sm:$0xff]  ;;  %v2297_v57 = vpack.c.bf16 %v608_v52, %v607_v51  ;;  %v641_v58 = vld [vmem:[%s3492_s1 + $0x160] sm:$0xff] }
  0xbf   : > { %2318 = vmatpush3.bf16.msra.mxu1 %v2315_v27  ;;  %2097 = vmatprep.mubr.f32.mxu1 %v593_v53  ;;  %v642_v59 = vld [vmem:[%s3492_s1 + $0x168] sm:$0xff]  ;;  %v2299_v60 = vpack.c.bf16 %v626_v55, %v625_v54  ;;  %v609_v61 = vld [vmem:[%s3492_s1 + $0x60] sm:$0xff]  ;;  %v627_v63 = vld [vmem:[%s3492_s1 + $0xf0] sm:$0xff] }
  0xc0   : > { %2320 = vmatprep.subr.bf16.mxu1 %v2319_v36  ;;  %v610_v62 = vld [vmem:[%s3492_s1 + $0x68] sm:$0xff]  ;;  %v628_v0 = vld [vmem:[%s3492_s1 + $0xf8] sm:$0xff]  ;;  %v2331_v1 = vpack.c.bf16 %v642_v59, %v641_v58  ;;  %v643_v3 = vld [vmem:[%s3492_s1 + $0x170] sm:$0xff] }
  0xc1   : > { %2290 = vmatpush3.bf16.msra.mxu0 %v2289_v37  ;;  %v2301_v2 = vpack.c.bf16 %v610_v62, %v609_v61  ;;  %v644_v4 = vld [vmem:[%s3492_s1 + $0x178] sm:$0xff]  ;;  %v2303_v5 = vpack.c.bf16 %v628_v0, %v627_v63  ;;  %v611_v6 = vld [vmem:[%s3492_s1 + $0x70] sm:$0xff]  ;;  %v804_v8 = vld [vmem:[#allocation2] sm:$0xff] }
  0xc2   : > { %2292 = vmatprep.subr.bf16.mxu0 %v2291_v40  ;;  %v612_v7 = vld [vmem:[%s3492_s1 + $0x78] sm:$0xff]  ;;  %v805_v9 = vld [vmem:[#allocation2 + $0x8] sm:$0xff]  ;;  %v2335_v10 = vpack.c.bf16 %v644_v4, %v643_v3  ;;  %v806_v13 = vld [vmem:[#allocation2 + $0x10] sm:$0xff] }
  0xc3   : > { %2322 = vmatpush3.bf16.msra.mxu1 %v2319_v36  ;;  %v2305_v11 = vpack.c.bf16 %v612_v7, %v611_v6  ;;  %v2339_v12 = vpack.c.bf16 %v805_v9, %v804_v8  ;;  %v807_v14 = vld [vmem:[#allocation2 + $0x18] sm:$0xff]  ;;  %v591_v15 = vld [vmem:[%s3313_s30] sm:$0xff]  ;;  %v596_v18 = vld [vmem:[%s3313_s30 + $0x28] sm:$0xff] }
  0xc4   : > { %2324 = vmatprep.subr.bf16.mxu1 %v2323_v45  ;;  %v595_v16 = vld [vmem:[%s3313_s30 + $0x20] sm:$0xff]  ;;  %v2343_v17 = vpack.c.bf16 %v807_v14, %v806_v13  ;;  %v809_v20 = vld [vmem:[#allocation2 + $0x28] sm:$0xff]  ;;  %v594_v21 = vld [vmem:[%s3313_s30 + $0x18] sm:$0xff] }
  0xc5   : > { %2294 = vmatpush3.bf16.msra.mxu0 %v2293_v47  ;;  %v808_v19 = vld [vmem:[#allocation2 + $0x20] sm:$0xff]  ;;  %v810_v23 = vld [vmem:[#allocation2 + $0x30] sm:$0xff]  ;;  %v811_v24 = vld [vmem:[#allocation2 + $0x38] sm:$0xff] }
  0xc6   : > { %2296 = vmatprep.subr.bf16.mxu0 %v2295_v50  ;;  %v2347_v22 = vpack.c.bf16 %v809_v20, %v808_v19  ;;  %v2351_v25 = vpack.c.bf16 %v811_v24, %v810_v23  ;;  %v812_v26 = vld [vmem:[#allocation2 + $0x40] sm:$0xff]  ;;  %v813_v27 = vld [vmem:[#allocation2 + $0x48] sm:$0xff]  ;;  %v814_v29 = vld [vmem:[#allocation2 + $0x50] sm:$0xff] }
  0xc7   : > { %2326 = vmatpush3.bf16.msra.mxu1 %v2323_v45  ;;  %v2355_v28 = vpack.c.bf16 %v813_v27, %v812_v26  ;;  %v815_v30 = vld [vmem:[#allocation2 + $0x58] sm:$0xff]  ;;  %v816_v32 = vld [vmem:[#allocation2 + $0x60] sm:$0xff]  ;;  %v817_v33 = vld [vmem:[#allocation2 + $0x68] sm:$0xff] }
  0xc8   : > { %2328 = vmatprep.subr.bf16.mxu1 %v2327_v56  ;;  %v2359_v31 = vpack.c.bf16 %v815_v30, %v814_v29  ;;  %v2363_v34 = vpack.c.bf16 %v817_v33, %v816_v32  ;;  %v818_v35 = vld [vmem:[#allocation2 + $0x70] sm:$0xff]  ;;  %v819_v36 = vld [vmem:[#allocation2 + $0x78] sm:$0xff]  ;;  %v905_v38 = vld [vmem:[#allocation4 + $0x8] sm:$0xff] }
  0xc9   : > { %2298 = vmatpush3.bf16.msra.mxu0 %v2297_v57  ;;  %v2367_v37 = vpack.c.bf16 %v819_v36, %v818_v35  ;;  %v908_v39 = vld [vmem:[#allocation4 + $0x20] sm:$0xff]  ;;  %v907_v42 = vld [vmem:[#allocation4 + $0x18] sm:$0xff]  ;;  %v906_v43 = vld [vmem:[#allocation4 + $0x10] sm:$0xff] }
  0xca   : > { %2300 = vmatprep.subr.bf16.mxu0 %v2299_v60  ;;  %v904_v40 = vld [vmem:[#allocation4] sm:$0xff]  ;;  %v2371_v41 = vpack.c.bf16 %v908_v39, %v905_v38  ;;  %v909_v44 = vld [vmem:[#allocation4 + $0x28] sm:$0xff]  ;;  %v911_v47 = vld [vmem:[#allocation4 + $0x38] sm:$0xff] }
  0xcb   : > { %2330 = vmatpush3.bf16.msra.mxu1 %v2327_v56  ;;  %v2373_v45 = vpack.c.bf16 %v907_v42, %v904_v40  ;;  %v3381_v46 = vpack.c.bf16 %v909_v44, %v906_v43  ;;  %v914_v48 = vld [vmem:[#allocation4 + $0x50] sm:$0xff]  ;;  %v913_v51 = vld [vmem:[#allocation4 + $0x48] sm:$0xff]  ;;  %v920_v54 = vld [vmem:[#allocation4 + $0x80] sm:$0xff] }
  0xcc   : > { %2332 = vmatprep.subr.bf16.mxu1 %v2331_v1  ;;  %v910_v49 = vld [vmem:[#allocation4 + $0x30] sm:$0xff]  ;;  %v2375_v50 = vpack.c.bf16 %v914_v48, %v911_v47  ;;  %v917_v53 = vld [vmem:[#allocation4 + $0x68] sm:$0xff]  ;;  %v916_v55 = vld [vmem:[#allocation4 + $0x60] sm:$0xff] }
  0xcd   : > { %2302 = vmatpush3.bf16.msra.mxu0 %v2301_v2  ;;  %v2377_v52 = vpack.c.bf16 %v913_v51, %v910_v49  ;;  %v2379_v56 = vpack.c.bf16 %v920_v54, %v917_v53  ;;  %v919_v57 = vld [vmem:[#allocation4 + $0x78] sm:$0xff]  ;;  %v926_v60 = vld [vmem:[#allocation4 + $0xb0] sm:$0xff]  ;;  %v925_v63 = vld [vmem:[#allocation4 + $0xa8] sm:$0xff] }
  0xce   : > { %2304 = vmatprep.subr.bf16.mxu0 %v2303_v5  ;;  %v2381_v58 = vpack.c.bf16 %v919_v57, %v916_v55  ;;  %v923_v59 = vld [vmem:[#allocation4 + $0x98] sm:$0xff]  ;;  %v922_v61 = vld [vmem:[#allocation4 + $0x90] sm:$0xff]  ;;  %v932_v2 = vld [vmem:[#allocation4 + $0xe0] sm:$0xff] }
  0xcf   : > { %2334 = vmatpush3.bf16.msra.mxu1 %v2331_v1  ;;  %v2383_v62 = vpack.c.bf16 %v926_v60, %v923_v59  ;;  %v2385_v0 = vpack.c.bf16 %v925_v63, %v922_v61  ;;  %v929_v1 = vld [vmem:[#allocation4 + $0xc8] sm:$0xff]  ;;  %v928_v3 = vld [vmem:[#allocation4 + $0xc0] sm:$0xff]  ;;  %v931_v5 = vld [vmem:[#allocation4 + $0xd8] sm:$0xff]  ;;  %v2948_v61 = vmov 0.0  }
  0xd0   : > { %2336 = vmatprep.subr.bf16.mxu1 %v2335_v10  ;;  %v2387_v4 = vpack.c.bf16 %v932_v2, %v929_v1  ;;  %v2389_v6 = vpack.c.bf16 %v931_v5, %v928_v3  ;;  %v935_v7 = vld [vmem:[#allocation4 + $0xf8] sm:$0xff]  ;;  %v938_v8 = vld [vmem:[#allocation4 + $0x110] sm:$0xff]  ;;  %v941_v13 = vld [vmem:[#allocation4 + $0x128] sm:$0xff]  ;;  %v954_v5 = vlaneseq }
  0xd1   : > { %2306 = vmatpush3.bf16.msra.mxu0 %v2305_v11  ;;  %v934_v9 = vld [vmem:[#allocation4 + $0xf0] sm:$0xff]  ;;  %v937_v11 = vld [vmem:[#allocation4 + $0x108] sm:$0xff]  ;;  %v944_v14 = vld [vmem:[#allocation4 + $0x140] sm:$0xff] }
  0xd2   : > { %2340 = vmatprep.subr.bf16.mxu0 %v2339_v12  ;;  %v912_v32 = vld [vmem:[#allocation4 + $0x40] sm:$0xff]  ;;  %v915_v33 = vld [vmem:[#allocation4 + $0x58] sm:$0xff]  ;;  %v921_v38 = vld [vmem:[#allocation4 + $0x88] sm:$0xff] }
  0xd3   : > { %2338 = vmatpush3.bf16.msra.mxu1 %v2335_v10  ;;  %v2391_v10 = vpack.c.bf16 %v938_v8, %v935_v7  ;;  %v2407_v36 = vpack.c.bf16 %v915_v33, %v912_v32  ;;  %v924_v40 = vld [vmem:[#allocation4 + $0xa0] sm:$0xff]  ;;  %v930_v43 = vld [vmem:[#allocation4 + $0xd0] sm:$0xff]  ;;  %v933_v44 = vld [vmem:[#allocation4 + $0xe8] sm:$0xff] }
  0xd4   : > { %717 = vmatmul.mubr.f32.vlgmr.msra.gmra.mrb[0].mxu0 %v591_v15  ;;  %2372 = vmatprep.subr.bf16.mxu1 %v2371_v41  ;;  %v940_v15 = vld [vmem:[#allocation4 + $0x120] sm:$0xff]  ;;  %v927_v41 = vld [vmem:[#allocation4 + $0xb8] sm:$0xff]  ;;  %v945_v51 = vld [vmem:[#allocation4 + $0x148] sm:$0xff] }
  0xd5   : > { %721 = vmatprep.mubr.f32.mxu0 %v595_v16  ;;  %2342 = vmatpush3.bf16.msra.mxu0 %v2339_v12  ;;  %v2393_v12 = vpack.c.bf16 %v937_v11, %v934_v9  ;;  %v2395_v16 = vpack.c.bf16 %v944_v14, %v941_v13  ;;  %v2415_v42 = vpack.c.bf16 %v927_v41, %v924_v40  ;;  %v936_v47 = vld [vmem:[#allocation4 + $0x100] sm:$0xff]  ;;  %v939_v48 = vld [vmem:[#allocation4 + $0x118] sm:$0xff]  ;;  %v950_v53 = vld [vmem:[#allocation4 + $0x170] sm:$0xff] }
  0xd6   : > { %2098 = vmatmul.mubr.f32.vlgmr.msra.gmra.mrb[0].mxu1 %v596_v18  ;;  %2344 = vmatprep.subr.bf16.mxu0 %v2343_v17  ;;  %v2423_v49 = vpack.c.bf16 %v939_v48, %v936_v47  ;;  %v946_v55 = vld [vmem:[#allocation4 + $0x150] sm:$0xff]  ;;  %v951_v59 = vld [vmem:[#allocation4 + $0x178] sm:$0xff]  ;;  %v952_v9 = vld [vmem:[%s3497_s6] sm:$0x7] }
  0xd7   : > { %2374 = vmatpush1.bf16.msra.mxu1 %v2373_v45  ;;  %v2419_v45 = vpack.c.bf16 %v933_v44, %v930_v43  ;;  %1033 = vmatprep.mubr.f32.mxu1 %v2948_v61  ;;  %v1165_v32 = vld [vmem:[#allocation6] sm:$0xff]  ;;  %v1171_v40 = vld [vmem:[#allocation6 + $0x30] sm:$0xff]  ;;  %v1174_v41 = vld [vmem:[#allocation6 + $0x48] sm:$0xff] }
  0xd8   : > { %722 = vmatmul.mubr.f32.gmra.mrb[2].mxu0 %v594_v21  ;;  %2376 = vmatprep.subr.bf16.mxu1 %v2375_v50  ;;  %v1911_v21 = vld [vmem:[%s3493_s2] ss:$0 sm:$0xff]  ;;  %v942_v50 = vld [vmem:[#allocation4 + $0x130] sm:$0xff]  ;;  %v1178_v48 = vld [vmem:[#allocation6 + $0x68] sm:$0xff] }
  0xd9   : > { %2346 = vmatpush3.bf16.msra.mxu0 %v2343_v17  ;;  %v943_v17 = vld [vmem:[#allocation4 + $0x138] sm:$0xff]  ;;  %v1175_v47 = vld [vmem:[#allocation6 + $0x50] sm:$0xff] }
  0xda   : > { %2348 = vmatprep.subr.bf16.mxu0 %v2347_v22  ;;  %v2397_v18 = vpack.c.bf16 %v943_v17, %v940_v15 }
  0xdb   : > { %2378 = vmatpush1.bf16.msra.mxu1 %v2377_v52  ;;  %v947_v52 = vld [vmem:[#allocation4 + $0x158] sm:$0xff] }
  0xdc   : > { %2380 = vmatprep.subr.bf16.mxu1 %v2379_v56  ;;  %v2399_v54 = vpack.c.bf16 %v950_v53, %v947_v52  ;;  %v949_v56 = vld [vmem:[#allocation4 + $0x168] sm:$0xff]  ;;  %v1179_v52 = vld [vmem:[#allocation6 + $0x70] sm:$0xff] }
  0xdd   : > { %2350 = vmatpush3.bf16.msra.mxu0 %v2347_v22  ;;  %v2401_v57 = vpack.c.bf16 %v949_v56, %v946_v55  ;;  %v1182_v53 = vld [vmem:[#allocation6 + $0x88] sm:$0xff] }
  0xde   : > { %2352 = vmatprep.subr.bf16.mxu0 %v2351_v25 }
  0xdf   : > { %2382 = vmatpush1.bf16.msra.mxu1 %v2381_v58  ;;  %v948_v58 = vld [vmem:[#allocation4 + $0x160] sm:$0xff] }
  0xe0   : > { %2384 = vmatprep.subr.bf16.mxu1 %v2383_v62  ;;  %v2431_v60 = vpack.c.bf16 %v951_v59, %v948_v58  ;;  %v1912_v62 = vld [vmem:[%s3495_s4] ss:$0 sm:$0xff]  ;;  %v1183_v58 = vld [vmem:[#allocation6 + $0x90] sm:$0xff]  ;;  %v1186_v59 = vld [vmem:[#allocation6 + $0xa8] sm:$0xff] }
  0xe1   : > { %2354 = vmatpush3.bf16.msra.mxu0 %v2351_v25 }
  0xe2   : > { %2356 = vmatprep.subr.bf16.mxu0 %v2355_v28 }
  0xe3   : > { %2386 = vmatpush1.bf16.msra.mxu1 %v2385_v0 }
  0xe4   : > { %2388 = vmatprep.subr.bf16.mxu1 %v2387_v4 }
  0xe5   : > { %2358 = vmatpush3.bf16.msra.mxu0 %v2355_v28 }
  0xe6   : > { %2360 = vmatprep.subr.bf16.mxu0 %v2359_v31 }
  0xe7   : > { %2390 = vmatpush1.bf16.msra.mxu1 %v2389_v6  ;;  %v3393_v6 = vshrl.u32 %v954_v5, 7 }
  0xe8   : > { %2392 = vmatprep.subr.bf16.mxu1 %v2391_v10 }
  0xe9   : > { %2362 = vmatpush3.bf16.msra.mxu0 %v2359_v31  ;;  %v956_v7 = vsub.s32 0, %v3393_v6  ;;  %v964_v8 = vsub.s32 2, %v3393_v6  ;;  %v960_v10 = vsub.s32 1, %v3393_v6 }
  0xea   : > { %2364 = vmatprep.subr.bf16.mxu0 %v2363_v34 }
  0xeb   : > { %2394 = vmatpush1.bf16.msra.mxu1 %v2393_v12  ;;  %v957_v11 = vrot.slane %v952_v9, %v956_v7  ;;  %v965_v12 = vrot.slane %v952_v9, %v964_v8  ;;  %v961_v14 = vrot.slane %v952_v9, %v960_v10  ;;  %v1189_v8 = vld [vmem:[#allocation6 + $0xc0] sm:$0xff]  ;;  %v1191_v9 = vld [vmem:[#allocation6 + $0xd0] sm:$0xff] }
  0xec   : > { %2396 = vmatprep.subr.bf16.mxu1 %v2395_v16 }
  0xed   : > { %2366 = vmatpush3.bf16.msra.mxu0 %v2363_v34 }
  0xee   : > { %2368 = vmatprep.subr.bf16.mxu0 %v2367_v37 }
  0xef   : > { %2398 = vmatpush1.bf16.msra.mxu1 %v2397_v18 }
  0xf0   : > { %2400 = vmatprep.subr.bf16.mxu1 %v2399_v54  ;;  %v1184_v54 = vld [vmem:[#allocation6 + $0x98] sm:$0xff] }
  0xf1   : > { %2370 = vmatpush3.bf16.msra.mxu0 %v2367_v37  ;;  %v918_v37 = vld [vmem:[#allocation4 + $0x70] sm:$0xff]  ;;  %v2451_v56 = vpack.c.bf16 %v1184_v54, %v1182_v53 }
  0xf2   : > { %2404 = vmatprep.subr.bf16.mxu0 %v3381_v46  ;;  %v2411_v39 = vpack.c.bf16 %v921_v38, %v918_v37 }
  0xf3   : > { %2402 = vmatpush1.bf16.msra.mxu1 %v2401_v57  ;;  %v1181_v57 = vld [vmem:[#allocation6 + $0x80] sm:$0xff] }
 0x1a7   : > { %v1951_v19 = vpop.f32.mrb[0].mxu0 }
 0x1a8   : > { %v1952_v20 = vpop.f32.mrb[1].mxu0 }
 0x1a9   : > { %v1953_v22 = vadd.f32 %v1952_v20, %v1951_v19  ;;  %v2099_v23 = vpop.f32.mrb[0].mxu1 }
 0x1aa   : > { %v793_v24 = vpop.f32.mrb[1].mxu1 }
 0x1ab   : > { %v1954_v25 = vpop.f32.mrb[2].mxu0  ;;  %v719_v26 = vadd.f32 %v1953_v22, %v1911_v21 }
 0x1ac   : > { %v1955_v27 = vpop.f32.mrb[3].mxu0 }
 0x1ad   : > { %v1956_v28 = vadd.f32 %v1955_v27, %v1954_v25  ;;  %v794_v29 = vadd.f32 %v793_v24, %v719_v26 }
 0x1af   : > { %v724_v30 = vadd.f32 %v1956_v28, %v1911_v21  ;;  %v802_v31 = vmax.f32 %v794_v29, 0.0 }
 0x1b1   : > { %v799_v34 = vadd.f32 %v2099_v23, %v724_v30  ;;  %2132 = vmatprep.mubr.f32.mxu0 %v802_v31  ;;  %v1166_v30 = vld [vmem:[#allocation6 + $0x8] sm:$0xff]  ;;  %v1168_v31 = vld [vmem:[#allocation6 + $0x18] sm:$0xff] }
 0x1b2   : > { %v2435_v33 = vpack.c.bf16 %v1168_v31, %v1166_v30  ;;  %v1204_v30 = vld [vmem:[#allocation6 + $0x138] sm:$0xff] }
 0x1b3   : > { %v803_v35 = vmax.f32 %v799_v34, 0.0  ;;  %v1167_v34 = vld [vmem:[#allocation6 + $0x10] sm:$0xff] }
 0x1b4   : > { %v2437_v37 = vpack.c.bf16 %v1167_v34, %v1165_v32  ;;  %2436 = vmatprep.subr.bf16.mxu1 %v2435_v33  ;;  %v1201_v33 = vld [vmem:[#allocation6 + $0x120] sm:$0xff]  ;;  %v1203_v34 = vld [vmem:[#allocation6 + $0x130] sm:$0xff] }
 0x1b5   : > { %2133 = vmatmul.mubr.f32.vlgmr.msra.gmra.mrb[4].mxu0 %v803_v35  ;;  %v1170_v35 = vld [vmem:[#allocation6 + $0x28] sm:$0xff] }
 0x1b6   : > { %2406 = vmatpush3.bf16.msra.mxu0 %v3381_v46  ;;  %v2427_v46 = vpack.c.bf16 %v945_v51, %v942_v50 }
 0x1b7   : > { %2408 = vmatprep.subr.bf16.mxu0 %v2407_v36 }
 0x1ba   : > { %2410 = vmatpush3.bf16.msra.mxu0 %v2407_v36  ;;  %v1172_v36 = vld [vmem:[#allocation6 + $0x38] sm:$0xff] }
 0x1bb   : > { %2412 = vmatprep.subr.bf16.mxu0 %v2411_v39  ;;  %v2439_v38 = vpack.c.bf16 %v1172_v36, %v1170_v35  ;;  %v1206_v35 = vld [vmem:[#allocation6 + $0x148] sm:$0xff]  ;;  %v1208_v36 = vld [vmem:[#allocation6 + $0x158] sm:$0xff] }
 0x1be   : > { %2414 = vmatpush3.bf16.msra.mxu0 %v2411_v39  ;;  %v1169_v39 = vld [vmem:[#allocation6 + $0x20] sm:$0xff] }
 0x1bf   : > { %2416 = vmatprep.subr.bf16.mxu0 %v2415_v42  ;;  %v2441_v43 = vpack.c.bf16 %v1171_v40, %v1169_v39  ;;  %v1205_v39 = vld [vmem:[#allocation6 + $0x140] sm:$0xff]  ;;  %v1207_v40 = vld [vmem:[#allocation6 + $0x150] sm:$0xff] }
 0x1c2   : > { %2418 = vmatpush3.bf16.msra.mxu0 %v2415_v42  ;;  %v1176_v42 = vld [vmem:[#allocation6 + $0x58] sm:$0xff] }
 0x1c3   : > { %2420 = vmatprep.subr.bf16.mxu0 %v2419_v45  ;;  %v2443_v44 = vpack.c.bf16 %v1176_v42, %v1174_v41  ;;  %v1210_v41 = vld [vmem:[#allocation6 + $0x168] sm:$0xff]  ;;  %v1212_v42 = vld [vmem:[#allocation6 + $0x178] sm:$0xff] }
 0x1c6   : > { %2422 = vmatpush3.bf16.msra.mxu0 %v2419_v45  ;;  %v1173_v45 = vld [vmem:[#allocation6 + $0x40] sm:$0xff] }
 0x1c7   : > { %2424 = vmatprep.subr.bf16.mxu0 %v2423_v49  ;;  %v2445_v50 = vpack.c.bf16 %v1175_v47, %v1173_v45  ;;  %v1209_v45 = vld [vmem:[#allocation6 + $0x160] sm:$0xff]  ;;  %v1211_v47 = vld [vmem:[#allocation6 + $0x170] sm:$0xff] }
 0x1ca   : > { %2426 = vmatpush3.bf16.msra.mxu0 %v2423_v49  ;;  %v1180_v49 = vld [vmem:[#allocation6 + $0x78] sm:$0xff] }
 0x1cb   : > { %2428 = vmatprep.subr.bf16.mxu0 %v2427_v46  ;;  %v2447_v51 = vpack.c.bf16 %v1180_v49, %v1178_v48  ;;  %v1214_v48 = vld [vmem:[#allocation6 + $0x188] sm:$0xff]  ;;  %v1216_v49 = vld [vmem:[#allocation6 + $0x198] sm:$0xff] }
 0x1ce   : > { %2430 = vmatpush3.bf16.msra.mxu0 %v2427_v46  ;;  %v1177_v46 = vld [vmem:[#allocation6 + $0x60] sm:$0xff] }
 0x1cf   : > { %2432 = vmatprep.subr.bf16.mxu0 %v2431_v60  ;;  %v2449_v55 = vpack.c.bf16 %v1179_v52, %v1177_v46 }
 0x1d2   : > { %2434 = vmatpush3.bf16.msra.mxu0 %v2431_v60  ;;  %v1188_v60 = vld [vmem:[#allocation6 + $0xb8] sm:$0xff] }
 0x288   : > { %v2134_v63 = vpop.f32.mrb[4].mxu0 }
 0x289   : > { %v899_v0 = vadd.f32 %v2134_v63, %v1912_v62  ;;  %v893_v1 = vpop.f32.mrb[5].mxu0  ;;  %v2455_v63 = vpack.c.bf16 %v1188_v60, %v1186_v59 }
 0x28a   : > { %v894_v2 = vadd.f32 %v1912_v62, %v893_v1  ;;  %v2453_v62 = vpack.c.bf16 %v1183_v58, %v1181_v57  ;;  %v1187_v1 = vld [vmem:[#allocation6 + $0xb0] sm:$0xff] }
 0x28b   : > { %v903_v4 = vmax.f32 %v899_v0, 0.0  ;;  %v1185_v0 = vld [vmem:[#allocation6 + $0xa0] sm:$0xff] }
 0x28c   : > { %v902_v3 = vmax.f32 %v894_v2, 0.0  ;;  %v1190_v2 = vld [vmem:[#allocation6 + $0xc8] sm:$0xff] }
 0x28e   : > { %1034 = vmatmul.mubr.f32.vlgmr.msra.gmra.mrb[2].mxu1 %v902_v3  ;;  %2167 = vmatprep.mubr.f32.mxu0 %v902_v3  ;;  %v1192_v3 = vld [vmem:[#allocation6 + $0xd8] sm:$0xff] }
 0x28f   : > { %2168 = vmatmul.mubr.f32.vlgmr.msra.gmra.mrb[6].mxu0 %v903_v4  ;;  %1039 = vmatprep.mubr.f32.mxu1 %v2948_v61  ;;  %v2459_v5 = vpack.c.bf16 %v1192_v3, %v1190_v2 }
 0x290   : > { %2438 = vmatpush1.bf16.msra.mxu1 %v2437_v37  ;;  %v2473_v37 = vpack.c.bf16 %v1203_v34, %v1201_v33  ;;  %v1225_v33 = vld [vmem:[#allocation6 + $0x1e0] sm:$0xff]  ;;  %v1227_v34 = vld [vmem:[#allocation6 + $0x1f0] sm:$0xff] }
 0x291   : > { %2440 = vmatprep.subr.bf16.mxu1 %v2439_v38  ;;  %v2475_v38 = vpack.c.bf16 %v1208_v36, %v1206_v35  ;;  %v2497_v35 = vpack.c.bf16 %v1227_v34, %v1225_v33  ;;  %v1230_v36 = vld [vmem:[#allocation6 + $0x208] sm:$0xff]  ;;  %v1245_v33 = vld [vmem:[#allocation6 + $0x280] sm:$0xff]  ;;  %v1247_v34 = vld [vmem:[#allocation6 + $0x290] sm:$0xff] }
 0x292   : > { %1040 = vmatmul.mubr.f32.gmra.mrb[4].mxu1 %v903_v4  ;;  %v2457_v4 = vpack.c.bf16 %v1187_v1, %v1185_v0 }
 0x294   : > { %2442 = vmatpush1.bf16.msra.mxu1 %v2441_v43  ;;  %v2477_v43 = vpack.c.bf16 %v1207_v40, %v1205_v39  ;;  %v1431_v39 = vld [vmem:[#allocation7] sm:$0xff]  ;;  %v1432_v40 = vld [vmem:[#allocation7 + $0x8] sm:$0xff] }
 0x295   : > { %2444 = vmatprep.subr.bf16.mxu1 %v2443_v44  ;;  %v2479_v44 = vpack.c.bf16 %v1212_v42, %v1210_v41  ;;  %v1433_v41 = vld [vmem:[#allocation7 + $0x10] sm:$0xff]  ;;  %v2531_v42 = vpack.c.bf16 %v1432_v40, %v1431_v39  ;;  %v1249_v39 = vld [vmem:[#allocation6 + $0x2a0] sm:$0xff] }
 0x296   : > { %v1251_v40 = vld [vmem:[#allocation6 + $0x2b0] sm:$0xff] }
 0x297   : > { %2532 = vmatprep.subr.bf16.mxu0 %v2531_v42 }
 0x298   : > { %2446 = vmatpush1.bf16.msra.mxu1 %v2445_v50  ;;  %v2481_v50 = vpack.c.bf16 %v1211_v47, %v1209_v45  ;;  %v1435_v45 = vld [vmem:[#allocation7 + $0x20] sm:$0xff]  ;;  %v1436_v47 = vld [vmem:[#allocation7 + $0x28] sm:$0xff]  ;;  %2534 = vmatpush3.bf16.msra.mxu0 %v2531_v42  ;;  %v1256_v42 = vld [vmem:[#allocation6 + $0x2d8] sm:$0xff] }
 0x299   : > { %2448 = vmatprep.subr.bf16.mxu1 %v2447_v51  ;;  %v2483_v51 = vpack.c.bf16 %v1216_v49, %v1214_v48  ;;  %v2539_v48 = vpack.c.bf16 %v1436_v47, %v1435_v45  ;;  %v1437_v49 = vld [vmem:[#allocation7 + $0x30] sm:$0xff]  ;;  %v1253_v45 = vld [vmem:[#allocation6 + $0x2c0] sm:$0xff] }
 0x29a   : > { %v1255_v47 = vld [vmem:[#allocation6 + $0x2d0] sm:$0xff] }
 0x29c   : > { %2450 = vmatpush1.bf16.msra.mxu1 %v2449_v55 }
 0x29d   : > { %2452 = vmatprep.subr.bf16.mxu1 %v2451_v56 }
 0x2a0   : > { %2454 = vmatpush1.bf16.msra.mxu1 %v2453_v62 }
 0x2a1   : > { %2456 = vmatprep.subr.bf16.mxu1 %v2455_v63 }
 0x2a4   : > { %2458 = vmatpush1.bf16.msra.mxu1 %v2457_v4 }
 0x2a5   : > { %2460 = vmatprep.subr.bf16.mxu1 %v2459_v5 }
 0x361   : > { %v1035_v13 = vpop.f32.mrb[2].mxu1 }
 0x362   : > { %v1037_v15 = vpop.f32.mrb[3].mxu1  ;;  %v2169_v16 = vpop.f32.mrb[6].mxu0  ;;  %v3405_v18 = vadd.f32 %v1035_v13, %v957_v11  ;;  %v2461_v13 = vpack.c.bf16 %v1191_v9, %v1189_v8  ;;  %v1213_v8 = vld [vmem:[#allocation6 + $0x180] sm:$0xff]  ;;  %v1215_v9 = vld [vmem:[#allocation6 + $0x190] sm:$0xff] }
 0x363   : > { %v1112_v17 = vpop.f32.mrb[7].mxu0  ;;  %v3409_v21 = vadd.f32 %v1037_v15, %v961_v14  ;;  %v3411_v22 = vadd.f32 %v2169_v16, %v965_v12  ;;  %v1193_v15 = vld [vmem:[#allocation6 + $0xe0] sm:$0xff]  ;;  %v1195_v16 = vld [vmem:[#allocation6 + $0xf0] sm:$0xff] }
 0x364   : > { %v3407_v19 = vadd.f32 %v1112_v17, %v965_v12  ;;  %v1196_v12 = vld [vmem:[#allocation6 + $0xf8] sm:$0xff]  ;;  %v1198_v17 = vld [vmem:[#allocation6 + $0x108] sm:$0xff]  ;;  %2462 = vmatpush1.bf16.msra.mxu1 %v2461_v13 }
 0x365   : > { %v1041_v20 = vpop.f32.mrb[4].mxu1  ;;  %v1220_v13 = vld [vmem:[#allocation6 + $0x1b8] sm:$0xff] }
 0x366   : > { %v3413_v23 = vadd.f32 %v1041_v20, %v957_v11  ;;  %v1043_v24 = vpop.f32.mrb[5].mxu1  ;;  %v1121_v25 = vmax.f32 %v3405_v18, %v3407_v19  ;;  %v1194_v11 = vld [vmem:[#allocation6 + $0xe8] sm:$0xff]  ;;  %v1200_v20 = vld [vmem:[#allocation6 + $0x118] sm:$0xff] }
 0x367   : > { %v3419_v27 = vadd.f32 %v1043_v24, %v961_v14  ;;  %v2463_v14 = vpack.c.bf16 %v1196_v12, %v1194_v11  ;;  %v2465_v24 = vpack.c.bf16 %v1195_v16, %v1193_v15  ;;  %v2485_v11 = vpack.c.bf16 %v1215_v9, %v1213_v8  ;;  %v1218_v12 = vld [vmem:[#allocation6 + $0x1a8] sm:$0xff]  ;;  %v1217_v15 = vld [vmem:[#allocation6 + $0x1a0] sm:$0xff]  ;;  %v1219_v16 = vld [vmem:[#allocation6 + $0x1b0] sm:$0xff] }
 0x368   : > { %v1125_v26 = vmax.f32 %v3413_v23, %v3411_v22  ;;  %v1122_v28 = vmax.f32 %v1121_v25, %v3409_v21  ;;  %v2467_v25 = vpack.c.bf16 %v1200_v20, %v1198_v17  ;;  %v2489_v17 = vpack.c.bf16 %v1219_v16, %v1217_v15  ;;  %v1222_v20 = vld [vmem:[#allocation6 + $0x1c8] sm:$0xff]  ;;  %v1233_v9 = vld [vmem:[#allocation6 + $0x220] sm:$0xff] }
 0x369   : > { %2464 = vmatprep.subr.bf16.mxu1 %v2463_v14  ;;  %v2487_v14 = vpack.c.bf16 %v1220_v13, %v1218_v12  ;;  %v1238_v13 = vld [vmem:[#allocation6 + $0x248] sm:$0xff] }
 0x36a   : > { %1123 = vmax.xlane.f32.xlu0 %v1122_v28  ;;  %v1126_v29 = vmax.f32 %v1125_v26, %v3419_v27  ;;  %v1197_v26 = vld [vmem:[#allocation6 + $0x100] sm:$0xff]  ;;  %v1199_v28 = vld [vmem:[#allocation6 + $0x110] sm:$0xff]  ;;  %2466 = vmatpush1.bf16.msra.mxu1 %v2465_v24  ;;  %v1224_v24 = vld [vmem:[#allocation6 + $0x1d8] sm:$0xff] }
 0x36b   : > { %v2469_v31 = vpack.c.bf16 %v1199_v28, %v1197_v26  ;;  %2468 = vmatprep.subr.bf16.mxu1 %v2467_v25  ;;  %v2491_v25 = vpack.c.bf16 %v1224_v24, %v1222_v20  ;;  %v1221_v26 = vld [vmem:[#allocation6 + $0x1c0] sm:$0xff]  ;;  %v1223_v28 = vld [vmem:[#allocation6 + $0x1d0] sm:$0xff]  ;;  %v1242_v24 = vld [vmem:[#allocation6 + $0x268] sm:$0xff] }
 0x36c   : > { %v1239_v20 = vld [vmem:[#allocation6 + $0x250] sm:$0xff] }
 0x36e   : > { %1127 = vmax.xlane.f32.xlu0 %v1126_v29  ;;  %v1202_v29 = vld [vmem:[#allocation6 + $0x128] sm:$0xff]  ;;  %2470 = vmatpush1.bf16.msra.mxu1 %v2469_v31  ;;  %v1228_v31 = vld [vmem:[#allocation6 + $0x1f8] sm:$0xff] }
 0x36f   : > { %v2471_v32 = vpack.c.bf16 %v1204_v30, %v1202_v29  ;;  %v2493_v29 = vpack.c.bf16 %v1223_v28, %v1221_v26  ;;  %v1226_v30 = vld [vmem:[#allocation6 + $0x1e8] sm:$0xff] }
 0x371   : > { %2472 = vmatprep.subr.bf16.mxu1 %v2471_v32  ;;  %v2495_v32 = vpack.c.bf16 %v1228_v31, %v1226_v30  ;;  %v1246_v30 = vld [vmem:[#allocation6 + $0x288] sm:$0xff]  ;;  %v1248_v31 = vld [vmem:[#allocation6 + $0x298] sm:$0xff] }
 0x372   : > { %2474 = vmatpush1.bf16.msra.mxu1 %v2473_v37  ;;  %v1232_v37 = vld [vmem:[#allocation6 + $0x218] sm:$0xff] }
 0x373   : > { %2476 = vmatprep.subr.bf16.mxu1 %v2475_v38  ;;  %v2499_v38 = vpack.c.bf16 %v1232_v37, %v1230_v36  ;;  %v1252_v36 = vld [vmem:[#allocation6 + $0x2b8] sm:$0xff]  ;;  %v2517_v37 = vpack.c.bf16 %v1247_v34, %v1245_v33  ;;  %v1649_v34 = vld [vmem:[#allocation10] sm:$0xff] }
 0x376   : > { %2478 = vmatpush1.bf16.msra.mxu1 %v2477_v43  ;;  %v1434_v43 = vld [vmem:[#allocation7 + $0x18] sm:$0xff] }
 0x377   : > { %2480 = vmatprep.subr.bf16.mxu1 %v2479_v44  ;;  %v2535_v44 = vpack.c.bf16 %v1434_v43, %v1433_v41  ;;  %v1254_v41 = vld [vmem:[#allocation6 + $0x2c8] sm:$0xff]  ;;  %v2521_v43 = vpack.c.bf16 %v1251_v40, %v1249_v39 }
 0x379   : > { %2536 = vmatprep.subr.bf16.mxu0 %v2535_v44 }
 0x37a   : > { %2482 = vmatpush1.bf16.msra.mxu1 %v2481_v50  ;;  %v1438_v50 = vld [vmem:[#allocation7 + $0x38] sm:$0xff]  ;;  %2538 = vmatpush3.bf16.msra.mxu0 %v2535_v44  ;;  %v2523_v44 = vpack.c.bf16 %v1256_v42, %v1254_v41 }
 0x37b   : > { %2484 = vmatprep.subr.bf16.mxu1 %v2483_v51  ;;  %2540 = vmatprep.subr.bf16.mxu0 %v2539_v48  ;;  %v2543_v51 = vpack.c.bf16 %v1438_v50, %v1437_v49  ;;  %v1260_v49 = vld [vmem:[#allocation6 + $0x2f8] sm:$0xff]  ;;  %v2525_v50 = vpack.c.bf16 %v1255_v47, %v1253_v45 }
 0x37c   : > { %v1652_v45 = vld [vmem:[#allocation10 + $0x18] sm:$0xff] }
 0x37e   : > { %2486 = vmatpush1.bf16.msra.mxu1 %v2485_v11  ;;  %2542 = vmatpush3.bf16.msra.mxu0 %v2539_v48  ;;  %v1235_v11 = vld [vmem:[#allocation6 + $0x230] sm:$0xff]  ;;  %v1258_v48 = vld [vmem:[#allocation6 + $0x2e8] sm:$0xff] }
 0x37f   : > { %2488 = vmatprep.subr.bf16.mxu1 %v2487_v14  ;;  %2544 = vmatprep.subr.bf16.mxu0 %v2543_v51  ;;  %v1240_v14 = vld [vmem:[#allocation6 + $0x258] sm:$0xff]  ;;  %v2505_v16 = vpack.c.bf16 %v1235_v11, %v1233_v9 }
 0x380   : > { %v1534_v9 = vld [vmem:[#allocation9 + $0x18] sm:$0xff] }
 0x382   : > { %2490 = vmatpush1.bf16.msra.mxu1 %v2489_v17  ;;  %2546 = vmatpush3.bf16.msra.mxu0 %v2543_v51  ;;  %v1237_v17 = vld [vmem:[#allocation6 + $0x240] sm:$0xff]  ;;  %v2527_v51 = vpack.c.bf16 %v1260_v49, %v1258_v48 }
 0x383   : > { %2492 = vmatprep.subr.bf16.mxu1 %v2491_v25  ;;  %v1244_v25 = vld [vmem:[#allocation6 + $0x278] sm:$0xff]  ;;  %v2509_v26 = vpack.c.bf16 %v1239_v20, %v1237_v17  ;;  %v1539_v20 = vld [vmem:[#allocation9 + $0x40] sm:$0xff] }
 0x384   : > { %v2511_v28 = vpack.c.bf16 %v1244_v25, %v1242_v24  ;;  %v1540_v24 = vld [vmem:[#allocation9 + $0x48] sm:$0xff] }
 0x385   : > { %v2579_v25 = vpack.c.bf16 %v1540_v24, %v1539_v20 }
 0x386   : > { %2494 = vmatpush1.bf16.msra.mxu1 %v2493_v29  ;;  %v1241_v29 = vld [vmem:[#allocation6 + $0x260] sm:$0xff] }
 0x387   : > { %2496 = vmatprep.subr.bf16.mxu1 %v2495_v32  ;;  %v2515_v32 = vpack.c.bf16 %v1248_v31, %v1246_v30  ;;  %v1544_v30 = vld [vmem:[#allocation9 + $0x68] sm:$0xff] }
 0x38a   : > { %2498 = vmatpush1.bf16.msra.mxu1 %v2497_v35  ;;  %v1250_v35 = vld [vmem:[#allocation6 + $0x2a8] sm:$0xff] }
 0x38b   : > { %2500 = vmatprep.subr.bf16.mxu1 %v2499_v38  ;;  %v2519_v38 = vpack.c.bf16 %v1252_v36, %v1250_v35  ;;  %v1650_v35 = vld [vmem:[#allocation10 + $0x8] sm:$0xff] }
 0x38c   : > { %v2595_v36 = vpack.c.bf16 %v1650_v35, %v1649_v34 }
 0x3f7   : > { %v1124_v46 = vpop.xlane.xlu0 %1123 }
 0x3f8   : > { %v3424_v52 = vsub.f32 %v3405_v18, %v1124_v46  ;;  %v3427_v53 = vsub.f32 %v3409_v21, %v1124_v46  ;;  %v3430_v54 = vsub.f32 %v3407_v19, %v1124_v46  ;;  %v1439_v46 = vld [vmem:[#allocation7 + $0x40] sm:$0xff] }
 0x3fa   : > { %v1135_v55 = vmul.f32 1.442695, %v3424_v52  ;;  %v1137_v56 = vmul.f32 1.442695, %v3427_v53  ;;  %v1139_v57 = vmul.f32 1.442695, %v3430_v54 }
 0x3fb   : > { %v1128_v58 = vpop.xlane.xlu0 %1127 }
 0x3fc   : > { %2712 = vpow2.f32 %v1135_v55  ;;  %v3436_v59 = vsub.f32 %v3413_v23, %v1128_v58  ;;  %v3439_v18 = vsub.f32 %v3419_v27, %v1128_v58  ;;  %v3442_v21 = vsub.f32 %v3411_v22, %v1128_v58  ;;  %v1440_v55 = vld [vmem:[#allocation7 + $0x48] sm:$0xff]  ;;  %v1442_v58 = vld [vmem:[#allocation7 + $0x58] sm:$0xff] }
 0x3fd   : > { %2714 = vpow2.f32 %v1137_v56  ;;  %v2547_v56 = vpack.c.bf16 %v1440_v55, %v1439_v46  ;;  %v1257_v46 = vld [vmem:[#allocation6 + $0x2e0] sm:$0xff]  ;;  %v1259_v55 = vld [vmem:[#allocation6 + $0x2f0] sm:$0xff] }
 0x3fe   : > { %v1141_v19 = vmul.f32 1.442695, %v3436_v59  ;;  %v1143_v60 = vmul.f32 1.442695, %v3439_v18  ;;  %2716 = vpow2.f32 %v1139_v57  ;;  %v1145_v62 = vmul.f32 1.442695, %v3442_v21 }
 0x3ff   : > { %v1441_v57 = vld [vmem:[#allocation7 + $0x50] sm:$0xff]  ;;  %2548 = vmatprep.subr.bf16.mxu0 %v2547_v56 }
 0x400   : > { %2718 = vpow2.f32 %v1141_v19  ;;  %v2551_v19 = vpack.c.bf16 %v1442_v58, %v1441_v57  ;;  %2550 = vmatpush3.bf16.msra.mxu0 %v2547_v56  ;;  %v2529_v56 = vpack.c.bf16 %v1259_v55, %v1257_v46  ;;  %v1654_v46 = vld [vmem:[#allocation10 + $0x28] sm:$0xff]  ;;  %v1656_v55 = vld [vmem:[#allocation10 + $0x38] sm:$0xff] }
 0x401   : > { %2720 = vpow2.f32 %v1143_v60 }
 0x402   : > { %2722 = vpow2.f32 %v1145_v62  ;;  %2552 = vmatprep.subr.bf16.mxu0 %v2551_v19 }
 0x404   : > { %2554 = vmatpush3.bf16.msra.mxu0 %v2551_v19  ;;  %v1443_v19 = vld [vmem:[#allocation7 + $0x60] sm:$0xff] }
 0x406   : > { %v2713_v63 = vpop.eup %2712 }
 0x407   : > { %v2715_v23 = vpop.eup %2714 }
 0x408   : > { %v1147_v0 = vadd.f32 %v2715_v23, %v2713_v63  ;;  %v2717_v1 = vpop.eup %2716  ;;  %v1229_v23 = vld [vmem:[#allocation6 + $0x200] sm:$0xff] }
 0x40a   : > { %v2719_v27 = vpop.eup %2718  ;;  %v1148_v2 = vadd.f32 %v2717_v1, %v1147_v0  ;;  %v1231_v0 = vld [vmem:[#allocation6 + $0x210] sm:$0xff] }
 0x40b   : > { %v2721_v3 = vpop.eup %2720 }
 0x40c   : > { %1149 = vadd.xlane.f32.xlu1 %v1148_v2  ;;  %v1151_v22 = vadd.f32 %v2721_v3, %v2719_v27  ;;  %v2723_v4 = vpop.eup %2722  ;;  %v1234_v27 = vld [vmem:[#allocation6 + $0x228] sm:$0xff]  ;;  %v1236_v2 = vld [vmem:[#allocation6 + $0x238] sm:$0xff] }
 0x40d   : > { %v2503_v8 = vpack.c.bf16 %v1236_v2, %v1234_v27  ;;  %v1531_v27 = vld [vmem:[#allocation9] sm:$0xff]  ;;  %v1532_v2 = vld [vmem:[#allocation9 + $0x8] sm:$0xff] }
 0x40e   : > { %v1152_v5 = vadd.f32 %v2723_v4, %v1151_v22  ;;  %v2501_v4 = vpack.c.bf16 %v1231_v0, %v1229_v23  ;;  %v1446_v23 = vld [vmem:[#allocation7 + $0x78] sm:$0xff] }
 0x410   : > { %1153 = vadd.xlane.f32.xlu1 %v1152_v5 }
 0x499   : > { %v1150_v60 = vpop.xlane.xlu1 %1149 }
 0x49a   : > { %2724 = vlog2.f32 %v1150_v60  ;;  %v1444_v60 = vld [vmem:[#allocation7 + $0x68] sm:$0xff] }
 0x49d   : > { %v1154_v62 = vpop.xlane.xlu1 %1153 }
 0x49e   : > { %2726 = vlog2.f32 %v1154_v62  ;;  %v2555_v62 = vpack.c.bf16 %v1444_v60, %v1443_v19  ;;  %v1659_v60 = vld [vmem:[#allocation10 + $0x50] sm:$0xff] }
 0x4a0   : > { %2556 = vmatprep.subr.bf16.mxu0 %v2555_v62 }
 0x4a1   : > { %2558 = vmatpush3.bf16.msra.mxu0 %v2555_v62  ;;  %v1660_v62 = vld [vmem:[#allocation10 + $0x58] sm:$0xff] }
 0x4a4   : > { %v2725_v63 = vpop.eup %2724 }
 0x4a5   : > { %v3447_v1 = vmul.f32 0.6931472, %v2725_v63  ;;  %v1445_v63 = vld [vmem:[#allocation7 + $0x70] sm:$0xff] }
 0x4a6   : > { %v2559_v0 = vpack.c.bf16 %v1446_v23, %v1445_v63  ;;  %v2615_v63 = vpack.c.bf16 %v1660_v62, %v1659_v60  ;;  %v1661_v23 = vld [vmem:[#allocation10 + $0x60] sm:$0xff] }
 0x4a7   : > { %v1159_v3 = vsub.f32 %v3424_v52, %v3447_v1  ;;  %v1160_v22 = vsub.f32 %v3427_v53, %v3447_v1  ;;  %v2507_v53 = vpack.c.bf16 %v1240_v14, %v1238_v13  ;;  %v1161_v57 = vsub.f32 %v3430_v54, %v3447_v1 }
 0x4a8   : > { %v2727_v5 = vpop.eup %2726  ;;  %2560 = vmatprep.subr.bf16.mxu0 %v2559_v0  ;;  %v2563_v54 = vpack.c.bf16 %v1532_v2, %v1531_v27  ;;  %v1663_v2 = vld [vmem:[#allocation10 + $0x70] sm:$0xff] }
 0x4a9   : > { %v3453_v12 = vmul.f32 0.6931472, %v2727_v5  ;;  %1337 = vmatprep.mubr.f32.mxu1 %v1160_v22  ;;  %2562 = vmatpush3.bf16.msra.mxu0 %v2559_v0  ;;  %v1662_v0 = vld [vmem:[#allocation10 + $0x68] sm:$0xff] }
 0x4aa   : > { %1338 = vmatmul.mubr.f32.vlgmr.msra.gmra.mrb[6].mxu1 %v1159_v3  ;;  %2564 = vmatprep.subr.bf16.mxu0 %v2563_v54  ;;  %v2619_v27 = vpack.c.bf16 %v1662_v0, %v1661_v23 }
 0x4ab   : > { %2502 = vmatpush1.bf16.msra.mxu1 %v2501_v4  ;;  %v1163_v15 = vsub.f32 %v3439_v18, %v3453_v12  ;;  %v1162_v52 = vsub.f32 %v3436_v59, %v3453_v12  ;;  %v1243_v18 = vld [vmem:[#allocation6 + $0x270] sm:$0xff]  ;;  %v1164_v58 = vsub.f32 %v3442_v21, %v3453_v12 }
 0x4ac   : > { %2504 = vmatprep.subr.bf16.mxu1 %v2503_v8  ;;  %v2513_v59 = vpack.c.bf16 %v1243_v18, %v1241_v29  ;;  %v1533_v8 = vld [vmem:[#allocation9 + $0x10] sm:$0xff]  ;;  %v1543_v18 = vld [vmem:[#allocation9 + $0x60] sm:$0xff] }
 0x4ad   : > { %1343 = vmatprep.mubr.f32.mxu1 %v1163_v15  ;;  %v2567_v14 = vpack.c.bf16 %v1534_v9, %v1533_v8  ;;  %v1535_v15 = vld [vmem:[#allocation9 + $0x20] sm:$0xff]  ;;  %v2587_v31 = vpack.c.bf16 %v1544_v30, %v1543_v18 }
 0x4ae   : > { %1344 = vmatmul.mubr.f32.gmra.mrb[8].mxu1 %v1162_v52  ;;  %v1536_v52 = vld [vmem:[#allocation9 + $0x28] sm:$0xff]  ;;  %v1915_v9 = vld [vmem:[%s3534_s10] ss:$0 sm:$0xff] }
 0x4af   : > { %2506 = vmatpush1.bf16.msra.mxu1 %v2505_v16  ;;  %1414 = vmatprep.mubr.f32.mxu1 %v2948_v61  ;;  %v2571_v16 = vpack.c.bf16 %v1536_v52, %v1535_v15 }
 0x4b0   : > { %2508 = vmatprep.subr.bf16.mxu1 %v2507_v53  ;;  %v1538_v53 = vld [vmem:[#allocation9 + $0x38] sm:$0xff] }
 0x4b3   : > { %2510 = vmatpush1.bf16.msra.mxu1 %v2509_v26  ;;  %v1541_v26 = vld [vmem:[#allocation9 + $0x50] sm:$0xff] }
 0x4b4   : > { %2512 = vmatprep.subr.bf16.mxu1 %v2511_v28  ;;  %v1542_v28 = vld [vmem:[#allocation9 + $0x58] sm:$0xff] }
 0x4b5   : > { %v2583_v29 = vpack.c.bf16 %v1542_v28, %v1541_v26 }
 0x4b7   : > { %2514 = vmatpush1.bf16.msra.mxu1 %v2513_v59  ;;  %v1545_v59 = vld [vmem:[#allocation9 + $0x70] sm:$0xff] }
 0x4b8   : > { %2516 = vmatprep.subr.bf16.mxu1 %v2515_v32  ;;  %v1546_v32 = vld [vmem:[#allocation9 + $0x78] sm:$0xff] }
 0x4b9   : > { %v2591_v33 = vpack.c.bf16 %v1546_v32, %v1545_v59 }
 0x4bb   : > { %2518 = vmatpush1.bf16.msra.mxu1 %v2517_v37 }
 0x4bc   : > { %2520 = vmatprep.subr.bf16.mxu1 %v2519_v38  ;;  %v1913_v38 = vld [vmem:[%s3532_s19] ss:$0 sm:$0xff] }
 0x4bf   : > { %2522 = vmatpush1.bf16.msra.mxu1 %v2521_v43 }
 0x4c0   : > { %2524 = vmatprep.subr.bf16.mxu1 %v2523_v44  ;;  %v1651_v44 = vld [vmem:[#allocation10 + $0x10] sm:$0xff] }
 0x4c1   : > { %v2599_v49 = vpack.c.bf16 %v1652_v45, %v1651_v44 }
 0x4c3   : > { %2526 = vmatpush1.bf16.msra.mxu1 %v2525_v50 }
 0x4c4   : > { %2528 = vmatprep.subr.bf16.mxu1 %v2527_v51  ;;  %v1653_v51 = vld [vmem:[#allocation10 + $0x20] sm:$0xff] }
 0x4c5   : > { %v2603_v6 = vpack.c.bf16 %v1654_v46, %v1653_v51 }
 0x4c7   : > { %2530 = vmatpush1.bf16.msra.mxu1 %v2529_v56 }
 0x4ca   : > { %1415 = vmatmul.mubr.f32.vlgmr.msra.gmra.mrb[6].mxu1 %v1161_v57  ;;  %v1657_v57 = vld [vmem:[#allocation10 + $0x40] sm:$0xff] }
 0x4cb   : > { %1420 = vmatprep.mubr.f32.mxu1 %v2948_v61  ;;  %v1261_v61 = vld [vmem:[%s3499_s8] sm:$0x3] }
 0x4cc   : > { %v1266_v21 = vrot.slane %v1261_v61, %v956_v7  ;;  %v1537_v7 = vld [vmem:[#allocation9 + $0x30] sm:$0xff]  ;;  %v1270_v37 = vrot.slane %v1261_v61, %v960_v10 }
 0x4cd   : > { %v2575_v17 = vpack.c.bf16 %v1538_v53, %v1537_v7  ;;  %v1655_v10 = vld [vmem:[#allocation10 + $0x30] sm:$0xff] }
 0x4ce   : > { %1421 = vmatmul.mubr.f32.gmra.mrb[8].mxu1 %v1164_v58  ;;  %v2607_v56 = vpack.c.bf16 %v1656_v55, %v1655_v10  ;;  %v1658_v58 = vld [vmem:[#allocation10 + $0x48] sm:$0xff] }
 0x4cf   : > { %v2611_v19 = vpack.c.bf16 %v1658_v58, %v1657_v57 }
 0x59d   : > { %v1416_v1 = vpop.f32.mrb[6].mxu1 }
 0x59e   : > { %v2627_v3 = vadd.f32 %v1416_v1, %v1266_v21  ;;  %v1418_v22 = vpop.f32.mrb[7].mxu1 }
 0x59f   : > { %v2628_v42 = vadd.f32 %v1418_v22, %v1270_v37 }
 0x5a0   : > { %v1427_v4 = vmax.f32 %v2627_v3, 0.0  ;;  %v1914_v3 = vld [vmem:[%s3533_s24] ss:$0 sm:$0xff] }
 0x5a1   : > { %v1422_v5 = vpop.f32.mrb[8].mxu1  ;;  %v1428_v50 = vmax.f32 %v2628_v42, 0.0 }
 0x5a2   : > { %v2629_v11 = vadd.f32 %v1422_v5, %v1266_v21  ;;  %v3470_v12 = vpop.f32.mrb[9].mxu1  ;;  %2202 = vmatprep.mubr.f32.mxu0 %v1427_v4 }
 0x5a3   : > { %v2630_v21 = vadd.f32 %v3470_v12, %v1270_v37 }
 0x5a4   : > { %v1429_v13 = vmax.f32 %v2629_v11, 0.0 }
 0x5a5   : > { %v1430_v1 = vmax.f32 %v2630_v21, 0.0 }
 0x5a6   : > { %2203 = vmatmul.mubr.f32.vlgmr.msra.gmra.mrb[8].mxu0 %v1429_v13 }
 0x5a7   : > { %2566 = vmatpush3.bf16.msra.mxu0 %v2563_v54  ;;  %v1664_v54 = vld [vmem:[#allocation10 + $0x78] sm:$0xff] }
 0x5a8   : > { %2568 = vmatprep.subr.bf16.mxu0 %v2567_v14  ;;  %v2623_v61 = vpack.c.bf16 %v1664_v54, %v1663_v2 }
 0x5ab   : > { %2570 = vmatpush3.bf16.msra.mxu0 %v2567_v14 }
 0x5ac   : > { %2572 = vmatprep.subr.bf16.mxu0 %v2571_v16 }
 0x5af   : > { %2574 = vmatpush3.bf16.msra.mxu0 %v2571_v16 }
 0x5b0   : > { %2576 = vmatprep.subr.bf16.mxu0 %v2575_v17 }
 0x5b3   : > { %2578 = vmatpush3.bf16.msra.mxu0 %v2575_v17 }
 0x5b4   : > { %2580 = vmatprep.subr.bf16.mxu0 %v2579_v25 }
 0x5b7   : > { %2582 = vmatpush3.bf16.msra.mxu0 %v2579_v25 }
 0x5b8   : > { %2584 = vmatprep.subr.bf16.mxu0 %v2583_v29 }
 0x5bb   : > { %2586 = vmatpush3.bf16.msra.mxu0 %v2583_v29 }
 0x5bc   : > { %2588 = vmatprep.subr.bf16.mxu0 %v2587_v31 }
 0x5bf   : > { %2590 = vmatpush3.bf16.msra.mxu0 %v2587_v31 }
 0x5c0   : > { %2592 = vmatprep.subr.bf16.mxu0 %v2591_v33 }
 0x5c3   : > { %2594 = vmatpush3.bf16.msra.mxu0 %v2591_v33 }
 0x5c4   : > { %2596 = vmatprep.subr.bf16.mxu0 %v2595_v36 }
 0x679   : > { %v2204_v39 = vpop.f32.mrb[8].mxu0 }
 0x67a   : > { %v1526_v40 = vadd.f32 %v2204_v39, %v1913_v38  ;;  %v1520_v41 = vpop.f32.mrb[9].mxu0 }
 0x67b   : > { %v1521_v43 = vadd.f32 %v1913_v38, %v1520_v41 }
 0x67c   : > { %v1530_v48 = vmax.f32 %v1526_v40, 0.0 }
 0x67d   : > { %v1529_v47 = vmax.f32 %v1521_v43, 0.0 }
 0x67f   : > { %2237 = vmatprep.mubr.f32.mxu0 %v1529_v47 }
 0x680   : > { %2238 = vmatmul.mubr.f32.vlgmr.msra.gmra.mrb[10].mxu0 %v1530_v48 }
 0x681   : > { %2598 = vmatpush3.bf16.msra.mxu0 %v2595_v36  ;;  %2272 = vmatprep.mubr.f32.mxu0 %v1428_v50 }
 0x682   : > { %2600 = vmatprep.subr.bf16.mxu0 %v2599_v49 }
 0x685   : > { %2602 = vmatpush3.bf16.msra.mxu0 %v2599_v49 }
 0x686   : > { %2604 = vmatprep.subr.bf16.mxu0 %v2603_v6 }
 0x689   : > { %2606 = vmatpush3.bf16.msra.mxu0 %v2603_v6 }
 0x68a   : > { %2608 = vmatprep.subr.bf16.mxu0 %v2607_v56 }
 0x68d   : > { %2610 = vmatpush3.bf16.msra.mxu0 %v2607_v56 }
 0x68e   : > { %2612 = vmatprep.subr.bf16.mxu0 %v2611_v19 }
 0x691   : > { %2614 = vmatpush3.bf16.msra.mxu0 %v2611_v19 }
 0x692   : > { %2616 = vmatprep.subr.bf16.mxu0 %v2615_v63 }
 0x695   : > { %2618 = vmatpush3.bf16.msra.mxu0 %v2615_v63 }
 0x696   : > { %2620 = vmatprep.subr.bf16.mxu0 %v2619_v27 }
 0x699   : > { %2622 = vmatpush3.bf16.msra.mxu0 %v2619_v27 }
 0x69a   : > { %2624 = vmatprep.subr.bf16.mxu0 %v2623_v61 }
 0x69d   : > { %2626 = vmatpush3.bf16.msra.mxu0 %v2623_v61 }
 0x6a0   : > { %2273 = vmatmul.mubr.f32.vlgmr.msra.gmra.mrb[12].mxu0 %v1430_v1 }
 0x753   : > { %v2239_v22 = vpop.f32.mrb[10].mxu0 }
 0x754   : > { %v1620_v4 = vpop.f32.mrb[11].mxu0  ;;  %v1626_v8 = vadd.f32 %v2239_v22, %v1914_v3 }
 0x755   : > { %v1621_v5 = vadd.f32 %v1914_v3, %v1620_v4 }
 0x757   : > { %1629 = vmax.xlane.f32.xlu0 %v1621_v5 }
 0x75b   : > { %1631 = vmax.xlane.f32.xlu0 %v1626_v8 }
 0x773   : > { %v2274_v11 = vpop.f32.mrb[12].mxu0 }
 0x774   : > { %v1738_v12 = vpop.f32.mrb[13].mxu0  ;;  %v1744_v14 = vadd.f32 %v2274_v11, %v1915_v9 }
 0x775   : > { %v1739_v13 = vadd.f32 %v1915_v9, %v1738_v12 }
 0x777   : > { %1747 = vmax.xlane.f32.xlu1 %v1739_v13 }
 0x77b   : > { %1749 = vmax.xlane.f32.xlu1 %v1744_v14 }
 0x7e4   : > { %v1630_v15 = vpop.xlane.xlu0 %1629 }
 0x7e5   : > { %v1633_v52 = vsub.f32 %v1621_v5, %v1630_v15 }
 0x7e7   : > { %v1635_v16 = vmul.f32 1.442695, %v1633_v52 }
 0x7e8   : > { %v1632_v7 = vpop.xlane.xlu0 %1631 }
 0x7e9   : > { %2728 = vpow2.f32 %v1635_v16  ;;  %v1634_v53 = vsub.f32 %v1626_v8, %v1632_v7 }
 0x7eb   : > { %v1637_v17 = vmul.f32 1.442695, %v1634_v53 }
 0x7ed   : > { %2730 = vpow2.f32 %v1637_v17 }
 0x7f3   : > { %v2729_v20 = vpop.eup %2728 }
 0x7f4   : > { %1639 = vadd.xlane.f32.xlu0 %v2729_v20 }
 0x7f7   : > { %v2731_v24 = vpop.eup %2730 }
 0x7f8   : > { %1641 = vadd.xlane.f32.xlu0 %v2731_v24 }
 0x804   : > { %v1748_v25 = vpop.xlane.xlu1 %1747 }
 0x805   : > { %v1751_v26 = vsub.f32 %v1739_v13, %v1748_v25 }
 0x807   : > { %v1753_v28 = vmul.f32 1.442695, %v1751_v26 }
 0x808   : > { %v1750_v29 = vpop.xlane.xlu1 %1749 }
 0x809   : > { %2732 = vpow2.f32 %v1753_v28  ;;  %v1752_v18 = vsub.f32 %v1744_v14, %v1750_v29 }
 0x80b   : > { %v1755_v30 = vmul.f32 1.442695, %v1752_v18 }
 0x80d   : > { %2734 = vpow2.f32 %v1755_v30 }
 0x813   : > { %v2733_v31 = vpop.eup %2732 }
 0x814   : > { %1757 = vadd.xlane.f32.xlu1 %v2733_v31 }
 0x817   : > { %v2735_v59 = vpop.eup %2734 }
 0x818   : > { %1759 = vadd.xlane.f32.xlu1 %v2735_v59 }
 0x881   : > { %v1640_v32 = vpop.xlane.xlu0 %1639 }
 0x882   : > { %2736 = vlog2.f32 %v1640_v32 }
 0x885   : > { %v1642_v33 = vpop.xlane.xlu0 %1641 }
 0x886   : > { %2738 = vlog2.f32 %v1642_v33 }
 0x88c   : > { %v2737_v34 = vpop.eup %2736 }
 0x88d   : > { %v1644_v35 = vmul.f32 0.6931472, %v2737_v34 }
 0x88f   : > { %v1647_v36 = vsub.f32 %v1633_v52, %v1644_v35 }
 0x890   : > { %v2739_v37 = vpop.eup %2738 }
 0x891   : > { %1767 = vst [vmem:[%s589_s14] sm:$0xff] %v1647_v36  ;;  %v1646_v38 = vmul.f32 0.6931472, %v2739_v37 }
 0x893   : > { %v1648_v39 = vsub.f32 %v1634_v53, %v1646_v38 }
 0x895   : > { %1768 = vst [vmem:[%s589_s14 + $0x10] sm:$0xff] %v1648_v39 }
 0x8a1   : > { %v1758_v40 = vpop.xlane.xlu1 %1757 }
 0x8a2   : > { %2740 = vlog2.f32 %v1758_v40 }
 0x8a5   : > { %v1760_v41 = vpop.xlane.xlu1 %1759 }
 0x8a6   : > { %2742 = vlog2.f32 %v1760_v41 }
 0x8ac   : > { %v2741_v42 = vpop.eup %2740 }
 0x8ad   : > { %v1762_v43 = vmul.f32 0.6931472, %v2741_v42 }
 0x8af   : > { %v1765_v44 = vsub.f32 %v1751_v26, %v1762_v43 }
 0x8b0   : > { %v2743_v45 = vpop.eup %2742 }
 0x8b1   : > { %1769 = vst [vmem:[%s589_s14 + $0x8] sm:$0xff] %v1765_v44  ;;  %v1764_v47 = vmul.f32 0.6931472, %v2743_v45 }
 0x8b3   : > { %v1766_v48 = vsub.f32 %v1752_v18, %v1764_v47 }
 0x8b5   : > { %1770 = vst [vmem:[%s589_s14 + $0x18] sm:$0xff] %v1766_v48 }
 0x8b6 PF: > { %s29_s18 = sadd.s32 1, %s2934_s18  }
 0x8b7   : > { %p26_p3 = scmp.ge.s32.totalorder %s29_s18, 6  }
 0x8b9   :  { %28 = sbr.rel (!%p26_p3) target bundleno = 11 (0xb), region = 135 }
 0x8c0   :  { %1795 = vsyncpa [#allocation3], 1 }
 0x8c1   :  { %1797 = vsyncpa [#allocation3 + $0x1], 1 }
 0x8c2   :  { %1798 = vsyncpa [#allocation5], 1 }
 0x8c3   :  { %1799 = vsyncpa [#allocation8], 1 }
 0x8c4   :  { %1800 = vsyncpa [#allocation11], 1 }

</bundles_post_ra>
